<compile_context>
chip_gen: v7x
topology: tpu7x:2x2x1
jax: 0.10.0
libtpu: 0.0.40
codegen_flags: <defaults>
</compile_context>

<pallas_src>
import math
import functools

import jax
import jax.numpy as jnp
from jax.experimental import pallas as pl
from jax.experimental.pallas import tpu as pltpu


def _block_kernel(x_q_ref, x_full_ref, mask_ref,
                  wq_ref, bq_ref, wkv_ref, bkv_ref,
                  wproj_ref, bproj_ref, g1_ref, be1_ref,
                  wff1_ref, bff1_ref, wff2_ref, bff2_ref, g2_ref, be2_ref,
                  o_ref,
                  q_scr, k_scr, v_scr, y_scr,
                  *, n_head, eps=1e-5):
    qi = pl.program_id(1)
    mm_dtype = k_scr.dtype           # matmul input dtype (bf16 by default)

    x_q = x_q_ref[0]                 # (TQ, C) f32 -- this query tile
    TQ, C = x_q.shape
    H = n_head
    D = C // H
    T = x_full_ref.shape[1]

    # ---- K / V projection over the full sequence: once per batch row.
    # One fused (T, C) x (C, 2C) matmul; results carried in VMEM scratch
    # across the query-tile axis (which is "arbitrary"; the batch axis stays
    # "parallel" for megacore sharding).
    @pl.when(qi == 0)
    def _():
        xf = x_full_ref[0].astype(mm_dtype)                        # (T, C)
        kv = jnp.dot(xf, wkv_ref[...],
                     preferred_element_type=jnp.float32) + bkv_ref[...]  # (T, 2C)
        for h in range(H):                                         # static, small
            k_scr[h] = kv[:, h * D:(h + 1) * D].astype(mm_dtype)          # (T, D)
            v_scr[h] = kv[:, C + h * D:C + (h + 1) * D].astype(mm_dtype)  # (T, D)

    # ---- Q projection for this tile (1/sqrt(D) already folded into wq/bq).
    q = jnp.dot(x_q.astype(mm_dtype), wq_ref[...],
                preferred_element_type=jnp.float32) + bq_ref[...]  # (TQ, C)
    for h in range(H):
        q_scr[h] = q[:, h * D:(h + 1) * D].astype(mm_dtype)        # (TQ, D)

    # ---- Attention: all heads batched, contraction on the last dims
    # (trans_b style -- no explicit transpose, no concat).
    att = jnp.einsum("hqd,hkd->hqk", q_scr[...], k_scr[...],
                     preferred_element_type=jnp.float32)           # (H, TQ, T)
    m = mask_ref[0]                                                # (1, T)
    # finite bias: a fully-masked row degrades to uniform attention, not NaN
    bias = jnp.where(m == 0.0, jnp.float32(-1e30), jnp.float32(0.0))
    att = att + bias[None]                                         # (1,1,T) bcast
    att = att - jnp.max(att, axis=-1, keepdims=True)
    p = jnp.exp(att)
    p = p * pl.reciprocal(jnp.sum(p, axis=-1, keepdims=True), approx=True)
    y_h = jnp.einsum("hqk,hkd->hqd", p.astype(mm_dtype), v_scr[...],
                     preferred_element_type=jnp.float32)           # (H, TQ, D)

    # Merge heads via lane-sliced scratch stores, then one full-width
    # (TQ,C)x(C,C) output projection (keeps the MXU contraction full).
    for h in range(H):
        y_scr[:, h * D:(h + 1) * D] = y_h[h].astype(mm_dtype)
    y = jnp.dot(y_scr[...], wproj_ref[...],
                preferred_element_type=jnp.float32) + bproj_ref[...]

    # ---- residual + LayerNorm 1 (f32 statistics) ----
    r1 = x_q + y
    mu1 = jnp.mean(r1, axis=-1, keepdims=True)
    var1 = jnp.mean((r1 - mu1) ** 2, axis=-1, keepdims=True)
    h1 = (r1 - mu1) * jax.lax.rsqrt(var1 + eps) * g1_ref[...] + be1_ref[...]

    # ---- FFN sublayer ----
    f = jnp.dot(h1.astype(mm_dtype), wff1_ref[...],
                preferred_element_type=jnp.float32) + bff1_ref[...]
    f = jnp.maximum(f, 0.0)
    f = jnp.dot(f.astype(mm_dtype), wff2_ref[...],
                preferred_element_type=jnp.float32) + bff2_ref[...]

    # ---- residual + LayerNorm 2 ----
    r2 = h1 + f
    mu2 = jnp.mean(r2, axis=-1, keepdims=True)
    var2 = jnp.mean((r2 - mu2) ** 2, axis=-1, keepdims=True)
    out = (r2 - mu2) * jax.lax.rsqrt(var2 + eps) * g2_ref[...] + be2_ref[...]

    o_ref[0] = out.astype(o_ref.dtype)


def _pick_tq(T, n_head):
    """Largest multiple-of-8 divisor of T (<=512) such that the batched
    per-head attention probabilities (H, TQ, T) f32 stay comfortably in VMEM."""
    if T <= 128:
        return T
    budget = 6 << 20
    divisors = [c for c in (512, 256, 128, 64, 32, 16, 8) if c <= T and T % c == 0]
    if not divisors:
        return T                      # odd T: single tile
    for cand in divisors:             # descending
        if 2 * 4 * n_head * cand * T <= budget:
            return cand
    return divisors[-1]


def transformer_block(x, mask, params, n_head, *, tq=None,
                      matmul_dtype=jnp.bfloat16, eps=1e-5):
    """x: (B, T, C) f32, mask: (B, T) (0 == masked key). Inference forward."""
    B, T, C = x.shape
    assert C % n_head == 0
    D = C // n_head
    TQ = tq if tq is not None else _pick_tq(T, n_head)
    assert T % TQ == 0
    nq = T // TQ

    f32 = jnp.float32
    scale = 1.0 / math.sqrt(D)
    wqkv = params["wqkv"].astype(f32)
    bqkv = params["bqkv"].astype(f32).reshape(1, 3 * C)
    # Split the fused QKV projection: Q alone (with the 1/sqrt(D) scale folded
    # in -- zero kernel cost), K and V kept fused as one (C, 2C) matmul.
    wq = (wqkv[:, 0 * C:1 * C] * scale).astype(matmul_dtype)
    wkv = wqkv[:, 1 * C:3 * C].astype(matmul_dtype)
    bq = bqkv[:, 0 * C:1 * C] * scale
    bkv = bqkv[:, 1 * C:3 * C]

    weights = [
        wq, bq, wkv, bkv,
        params["wproj"].astype(matmul_dtype), params["bproj"].astype(f32),
        params["g1"].astype(f32), params["be1"].astype(f32),
        params["wff1"].astype(matmul_dtype), params["bff1"].astype(f32),
        params["wff2"].astype(matmul_dtype), params["bff2"].astype(f32),
        params["g2"].astype(f32), params["be2"].astype(f32),
    ]

    if mask is None:
        mask = jnp.ones((B, T), f32)
    mask3 = mask.reshape(B, 1, T).astype(f32)

    # ---- explicit VMEM budget (weights + double-buffered blocks + scratch
    #      + live f32 intermediates), 2x margin, capped at v7x per-core VMEM ----
    mm_isize = weights[0].dtype.itemsize
    weight_bytes = sum(int(a.size) * a.dtype.itemsize for a in weights)
    act_bytes = 2 * 4 * (2 * TQ * C + T * C + T)                     # pipelined blocks
    scratch_bytes = mm_isize * (n_head * TQ * D + 2 * n_head * T * D + TQ * C)
    live_bytes = 4 * (2 * n_head * TQ * T + TQ * 4 * C + 3 * TQ * C + 2 * T * C)
    vmem_limit = int(min(64 << 20,
                         max(32 << 20,
                             2 * (weight_bytes + act_bytes + scratch_bytes
                                  + live_bytes))))

    kernel = functools.partial(_block_kernel, n_head=n_head, eps=eps)

    def build(resident_weights):
        if resident_weights:
            # Whole weight resident in VMEM once: no per-grid-step DMA and no
            # double buffering (halves weight VMEM vs. blocked specs).
            wspecs = [pl.BlockSpec(memory_space=pltpu.MemorySpace.VMEM)
                      for _ in weights]
        else:
            wspecs = [pl.BlockSpec(w.shape, lambda b, q: (0, 0)) for w in weights]
        return pl.pallas_call(
            kernel,
            out_shape=jax.ShapeDtypeStruct((B, T, C), x.dtype),
            grid_spec=pltpu.PrefetchScalarGridSpec(
                num_scalar_prefetch=0,
                grid=(B, nq),
                in_specs=[
                    pl.BlockSpec((1, TQ, C), lambda b, q: (b, q, 0)),  # x (Q tile)
                    pl.BlockSpec((1, T, C), lambda b, q: (b, 0, 0)),   # x (full, K/V)
                    pl.BlockSpec((1, 1, T), lambda b, q: (b, 0, 0)),   # mask
                ] + wspecs,
                out_specs=pl.BlockSpec((1, TQ, C), lambda b, q: (b, q, 0)),
                scratch_shapes=[
                    pltpu.VMEM((n_head, TQ, D), matmul_dtype),  # Q heads
                    pltpu.VMEM((n_head, T, D), matmul_dtype),   # K heads (carried)
                    pltpu.VMEM((n_head, T, D), matmul_dtype),   # V heads (carried)
                    pltpu.VMEM((TQ, C), matmul_dtype),          # merged head outputs
                ]),
            compiler_params=pltpu.CompilerParams(
                # batch axis feeds the 2 TensorCores on v7x; the query-tile
                # axis carries the K/V scratch so it must stay "arbitrary".
                dimension_semantics=("parallel", "arbitrary"),
                vmem_limit_bytes=vmem_limit),
        )

    try:
        return build(True)(x, x, mask3, *weights)
    except Exception:
        # Fallback: plain full-array BlockSpecs if space-only VMEM operands
        # are not supported by the installed JAX version.
        return build(False)(x, x, mask3, *weights)


# ---------------- plain-JAX reference (for verification) ----------------
def ref_block(x, mask, p, n_head, eps=1e-5):
    B, T, C = x.shape
    D = C // n_head
    qkv = x @ p["wqkv"] + p["bqkv"]
    q, k, v = jnp.split(qkv, 3, axis=-1)
    q = q.reshape(B, T, n_head, D).transpose(0, 2, 1, 3)
    k = k.reshape(B, T, n_head, D).transpose(0, 2, 1, 3)
    v = v.reshape(B, T, n_head, D).transpose(0, 2, 1, 3)
    att = jnp.einsum("bhqd,bhkd->bhqk", q, k) / math.sqrt(D)
    att = jnp.where(mask[:, None, None, :] == 0, -jnp.inf, att)
    att = jax.nn.softmax(att, axis=-1)
    y = jnp.einsum("bhqk,bhkd->bhqd", att, v).transpose(0, 2, 1, 3).reshape(B, T, C)
    y = y @ p["wproj"] + p["bproj"]

    def ln(z, g, b):
        mu = z.mean(-1, keepdims=True)
        var = ((z - mu) ** 2).mean(-1, keepdims=True)
        return (z - mu) / jnp.sqrt(var + eps) * g + b

    h1 = ln(x + y, p["g1"], p["be1"])
    f = jnp.maximum(h1 @ p["wff1"] + p["bff1"], 0.0) @ p["wff2"] + p["bff2"]
    return ln(h1 + f, p["g2"], p["be2"])


def init_params(key, C):
    ks = jax.random.split(key, 6)
    s = 0.02
    return {
        "wqkv":  jax.random.normal(ks[0], (C, 3 * C), jnp.float32) * s,
        "bqkv":  jnp.zeros((1, 3 * C), jnp.float32),
        "wproj": jax.random.normal(ks[1], (C, C), jnp.float32) * s,
        "bproj": jnp.zeros((1, C), jnp.float32),
        "g1":    jnp.ones((1, C), jnp.float32),
        "be1":   jnp.zeros((1, C), jnp.float32),
        "wff1":  jax.random.normal(ks[2], (C, 4 * C), jnp.float32) * s,
        "bff1":  jax.random.normal(ks[3], (1, 4 * C), jnp.float32) * s,
        "wff2":  jax.random.normal(ks[4], (4 * C, C), jnp.float32) * s,
        "bff2":  jax.random.normal(ks[5], (1, C), jnp.float32) * s,
        "g2":    jnp.ones((1, C), jnp.float32),
        "be2":   jnp.zeros((1, C), jnp.float32),
    }


if __name__ == "__main__":
    B, T, C, n_head = 2, 8, 32, 4
    key = jax.random.PRNGKey(0)
    kx, kp = jax.random.split(key)

    x = jax.random.normal(kx, (B, T, C), jnp.float32)
    # mask: 1 = attend, 0 = masked key position (last two keys of batch 1 masked)
    mask = jnp.ones((B, T), jnp.float32).at[1, -2:].set(0.0)
    params = init_params(kp, C)

    ref = ref_block(x, mask, params, n_head)

    # f32-matmul path: tight structural check of the kernel
    out_f32 = jax.block_until_ready(
        transformer_block(x, mask, params, n_head, matmul_dtype=jnp.float32))
    assert out_f32.shape == (B, T, C)
    assert jnp.allclose(out_f32, ref, atol=1e-2, rtol=1e-2), "f32 path mismatch"

    # bf16-matmul path (default MXU fast path): looser tolerance vs f32 reference
    out_bf16 = jax.block_until_ready(
        transformer_block(x, mask, params, n_head))
    assert out_bf16.shape == (B, T, C)
    assert jnp.allclose(out_bf16, ref, atol=5e-2, rtol=5e-2), "bf16 path mismatch"

    print("KERNEL_OK")
</pallas_src>

<mosaic_0001>
module attributes {stable_mosaic.version = 11 : i64} {
  func.func @_block_kernel(%arg0: i32, %arg1: i32, %arg2: memref<1x8x32xf32, #tpu.memory_space<vmem>>, %arg3: memref<1x8x32xf32, #tpu.memory_space<vmem>>, %arg4: memref<1x1x8xf32, #tpu.memory_space<vmem>>, %arg5: memref<32x32xf32, #tpu.memory_space<vmem>>, %arg6: memref<1x32xf32, #tpu.memory_space<vmem>>, %arg7: memref<32x64xf32, #tpu.memory_space<vmem>>, %arg8: memref<1x64xf32, #tpu.memory_space<vmem>>, %arg9: memref<32x32xf32, #tpu.memory_space<vmem>>, %arg10: memref<1x32xf32, #tpu.memory_space<vmem>>, %arg11: memref<1x32xf32, #tpu.memory_space<vmem>>, %arg12: memref<1x32xf32, #tpu.memory_space<vmem>>, %arg13: memref<32x128xf32, #tpu.memory_space<vmem>>, %arg14: memref<1x128xf32, #tpu.memory_space<vmem>>, %arg15: memref<128x32xf32, #tpu.memory_space<vmem>>, %arg16: memref<1x32xf32, #tpu.memory_space<vmem>>, %arg17: memref<1x32xf32, #tpu.memory_space<vmem>>, %arg18: memref<1x32xf32, #tpu.memory_space<vmem>>, %arg19: memref<1x8x32xf32, #tpu.memory_space<vmem>>, %arg20: memref<4x8x8xf32, #tpu.memory_space<vmem>>, %arg21: memref<4x8x8xf32, #tpu.memory_space<vmem>>, %arg22: memref<4x8x8xf32, #tpu.memory_space<vmem>>, %arg23: memref<8x32xf32, #tpu.memory_space<vmem>>) attributes {dimension_semantics = [#tpu.dimension_semantics<parallel>, #tpu.dimension_semantics<arbitrary>], iteration_bounds = array<i64: 2, 1>, scalar_prefetch = 0 : i64, scratch_operands = 4 : i64, tpu.core_type = #tpu.core_type<tc>, window_params = [{transform_indices = @transform_0, window_bounds = array<i64: 1, 8, 32>}, {transform_indices = @transform_1, window_bounds = array<i64: 1, 8, 32>}, {transform_indices = @transform_2, window_bounds = array<i64: 1, 1, 8>}, {pipeline_mode = #tpu.pipeline_mode<synchronous>, transform_indices = @transform_3, window_bounds = array<i64: 32, 32>}, {pipeline_mode = #tpu.pipeline_mode<synchronous>, transform_indices = @transform_4, window_bounds = array<i64: 1, 32>}, {pipeline_mode = #tpu.pipeline_mode<synchronous>, transform_indices = @transform_5, window_bounds = array<i64: 32, 64>}, {pipeline_mode = #tpu.pipeline_mode<synchronous>, transform_indices = @transform_6, window_bounds = array<i64: 1, 64>}, {pipeline_mode = #tpu.pipeline_mode<synchronous>, transform_indices = @transform_7, window_bounds = array<i64: 32, 32>}, {pipeline_mode = #tpu.pipeline_mode<synchronous>, transform_indices = @transform_8, window_bounds = array<i64: 1, 32>}, {pipeline_mode = #tpu.pipeline_mode<synchronous>, transform_indices = @transform_9, window_bounds = array<i64: 1, 32>}, {pipeline_mode = #tpu.pipeline_mode<synchronous>, transform_indices = @transform_10, window_bounds = array<i64: 1, 32>}, {pipeline_mode = #tpu.pipeline_mode<synchronous>, transform_indices = @transform_11, window_bounds = array<i64: 32, 128>}, {pipeline_mode = #tpu.pipeline_mode<synchronous>, transform_indices = @transform_12, window_bounds = array<i64: 1, 128>}, {pipeline_mode = #tpu.pipeline_mode<synchronous>, transform_indices = @transform_13, window_bounds = array<i64: 128, 32>}, {pipeline_mode = #tpu.pipeline_mode<synchronous>, transform_indices = @transform_14, window_bounds = array<i64: 1, 32>}, {pipeline_mode = #tpu.pipeline_mode<synchronous>, transform_indices = @transform_15, window_bounds = array<i64: 1, 32>}, {pipeline_mode = #tpu.pipeline_mode<synchronous>, transform_indices = @transform_16, window_bounds = array<i64: 1, 32>}, {transform_indices = @transform_17, window_bounds = array<i64: 1, 8, 32>}]} {
    %c0 = arith.constant 0 : index
    %c0_0 = arith.constant 0 : index
    %c0_1 = arith.constant 0 : index
    %0 = vector.load %arg2[%c0, %c0_0, %c0_1] : memref<1x8x32xf32, #tpu.memory_space<vmem>>, vector<1x8x32xf32>
    %1 = vector.shape_cast %0 : vector<1x8x32xf32> to vector<8x32xf32>
    %c0_i32 = arith.constant 0 : i32
    %2 = arith.cmpi eq, %arg1, %c0_i32 : i32
    %3 = arith.extui %2 : i1 to i32
    %c0_i32_2 = arith.constant 0 : i32
    %4 = arith.cmpi ne, %3, %c0_i32_2 : i32
    scf.if %4 {
      %c0_79 = arith.constant 0 : index
      %c0_80 = arith.constant 0 : index
      %c0_81 = arith.constant 0 : index
      %134 = vector.load %arg3[%c0_79, %c0_80, %c0_81] : memref<1x8x32xf32, #tpu.memory_space<vmem>>, vector<1x8x32xf32>
      %135 = vector.shape_cast %134 : vector<1x8x32xf32> to vector<8x32xf32>
      %c0_82 = arith.constant 0 : index
      %c0_83 = arith.constant 0 : index
      %136 = vector.load %arg7[%c0_82, %c0_83] : memref<32x64xf32, #tpu.memory_space<vmem>>, vector<32x64xf32>
      %cst_84 = arith.constant dense<0.000000e+00> : vector<8x64xf32>
      %137 = tpu.matmul %135, %136, %cst_84 {dimension_numbers = #tpu.dot_dimension_numbers<[1], [0], [0], [1], [0, 0, 1, 1], [], []>} : vector<8x32xf32>, vector<32x64xf32>, vector<8x64xf32> -> vector<8x64xf32>
      %c0_85 = arith.constant 0 : index
      %c0_86 = arith.constant 0 : index
      %138 = vector.load %arg8[%c0_85, %c0_86] : memref<1x64xf32, #tpu.memory_space<vmem>>, vector<1x64xf32>
      %139 = vector.broadcast %138 : vector<1x64xf32> to vector<8x64xf32>
      %140 = arith.addf %137, %139 : vector<8x64xf32>
      %141 = vector.extract_strided_slice %140 {offsets = [0, 0], sizes = [8, 8], strides = [1, 1]} : vector<8x64xf32> to vector<8x8xf32>
      %c0_87 = arith.constant 0 : index
      %c0_88 = arith.constant 0 : index
      %c0_89 = arith.constant 0 : index
      %142 = vector.load %arg21[%c0_87, %c0_88, %c0_89] : memref<4x8x8xf32, #tpu.memory_space<vmem>>, vector<1x8x8xf32>
      %143 = vector.shape_cast %142 : vector<1x8x8xf32> to vector<8x8xf32>
      %144 = vector.shape_cast %141 : vector<8x8xf32> to vector<1x8x8xf32>
      tpu.vector_store %arg21[%c0_87, %c0_88, %c0_89], %144 {strides = array<i32>} : memref<4x8x8xf32, #tpu.memory_space<vmem>>, vector<1x8x8xf32>,
      %145 = vector.extract_strided_slice %140 {offsets = [0, 32], sizes = [8, 8], strides = [1, 1]} : vector<8x64xf32> to vector<8x8xf32>
      %c0_90 = arith.constant 0 : index
      %c0_91 = arith.constant 0 : index
      %c0_92 = arith.constant 0 : index
      %146 = vector.load %arg22[%c0_90, %c0_91, %c0_92] : memref<4x8x8xf32, #tpu.memory_space<vmem>>, vector<1x8x8xf32>
      %147 = vector.shape_cast %146 : vector<1x8x8xf32> to vector<8x8xf32>
      %148 = vector.shape_cast %145 : vector<8x8xf32> to vector<1x8x8xf32>
      tpu.vector_store %arg22[%c0_90, %c0_91, %c0_92], %148 {strides = array<i32>} : memref<4x8x8xf32, #tpu.memory_space<vmem>>, vector<1x8x8xf32>,
      %149 = vector.extract_strided_slice %140 {offsets = [0, 8], sizes = [8, 8], strides = [1, 1]} : vector<8x64xf32> to vector<8x8xf32>
      %c1_93 = arith.constant 1 : index
      %c0_94 = arith.constant 0 : index
      %c0_95 = arith.constant 0 : index
      %150 = vector.load %arg21[%c1_93, %c0_94, %c0_95] : memref<4x8x8xf32, #tpu.memory_space<vmem>>, vector<1x8x8xf32>
      %151 = vector.shape_cast %150 : vector<1x8x8xf32> to vector<8x8xf32>
      %152 = vector.shape_cast %149 : vector<8x8xf32> to vector<1x8x8xf32>
      tpu.vector_store %arg21[%c1_93, %c0_94, %c0_95], %152 {strides = array<i32>} : memref<4x8x8xf32, #tpu.memory_space<vmem>>, vector<1x8x8xf32>,
      %153 = vector.extract_strided_slice %140 {offsets = [0, 40], sizes = [8, 8], strides = [1, 1]} : vector<8x64xf32> to vector<8x8xf32>
      %c1_96 = arith.constant 1 : index
      %c0_97 = arith.constant 0 : index
      %c0_98 = arith.constant 0 : index
      %154 = vector.load %arg22[%c1_96, %c0_97, %c0_98] : memref<4x8x8xf32, #tpu.memory_space<vmem>>, vector<1x8x8xf32>
      %155 = vector.shape_cast %154 : vector<1x8x8xf32> to vector<8x8xf32>
      %156 = vector.shape_cast %153 : vector<8x8xf32> to vector<1x8x8xf32>
      tpu.vector_store %arg22[%c1_96, %c0_97, %c0_98], %156 {strides = array<i32>} : memref<4x8x8xf32, #tpu.memory_space<vmem>>, vector<1x8x8xf32>,
      %157 = vector.extract_strided_slice %140 {offsets = [0, 16], sizes = [8, 8], strides = [1, 1]} : vector<8x64xf32> to vector<8x8xf32>
      %c2_99 = arith.constant 2 : index
      %c0_100 = arith.constant 0 : index
      %c0_101 = arith.constant 0 : index
      %158 = vector.load %arg21[%c2_99, %c0_100, %c0_101] : memref<4x8x8xf32, #tpu.memory_space<vmem>>, vector<1x8x8xf32>
      %159 = vector.shape_cast %158 : vector<1x8x8xf32> to vector<8x8xf32>
      %160 = vector.shape_cast %157 : vector<8x8xf32> to vector<1x8x8xf32>
      tpu.vector_store %arg21[%c2_99, %c0_100, %c0_101], %160 {strides = array<i32>} : memref<4x8x8xf32, #tpu.memory_space<vmem>>, vector<1x8x8xf32>,
      %161 = vector.extract_strided_slice %140 {offsets = [0, 48], sizes = [8, 8], strides = [1, 1]} : vector<8x64xf32> to vector<8x8xf32>
      %c2_102 = arith.constant 2 : index
      %c0_103 = arith.constant 0 : index
      %c0_104 = arith.constant 0 : index
      %162 = vector.load %arg22[%c2_102, %c0_103, %c0_104] : memref<4x8x8xf32, #tpu.memory_space<vmem>>, vector<1x8x8xf32>
      %163 = vector.shape_cast %162 : vector<1x8x8xf32> to vector<8x8xf32>
      %164 = vector.shape_cast %161 : vector<8x8xf32> to vector<1x8x8xf32>
      tpu.vector_store %arg22[%c2_102, %c0_103, %c0_104], %164 {strides = array<i32>} : memref<4x8x8xf32, #tpu.memory_space<vmem>>, vector<1x8x8xf32>,
      %165 = vector.extract_strided_slice %140 {offsets = [0, 24], sizes = [8, 8], strides = [1, 1]} : vector<8x64xf32> to vector<8x8xf32>
      %c3_105 = arith.constant 3 : index
      %c0_106 = arith.constant 0 : index
      %c0_107 = arith.constant 0 : index
      %166 = vector.load %arg21[%c3_105, %c0_106, %c0_107] : memref<4x8x8xf32, #tpu.memory_space<vmem>>, vector<1x8x8xf32>
      %167 = vector.shape_cast %166 : vector<1x8x8xf32> to vector<8x8xf32>
      %168 = vector.shape_cast %165 : vector<8x8xf32> to vector<1x8x8xf32>
      tpu.vector_store %arg21[%c3_105, %c0_106, %c0_107], %168 {strides = array<i32>} : memref<4x8x8xf32, #tpu.memory_space<vmem>>, vector<1x8x8xf32>,
      %169 = vector.extract_strided_slice %140 {offsets = [0, 56], sizes = [8, 8], strides = [1, 1]} : vector<8x64xf32> to vector<8x8xf32>
      %c3_108 = arith.constant 3 : index
      %c0_109 = arith.constant 0 : index
      %c0_110 = arith.constant 0 : index
      %170 = vector.load %arg22[%c3_108, %c0_109, %c0_110] : memref<4x8x8xf32, #tpu.memory_space<vmem>>, vector<1x8x8xf32>
      %171 = vector.shape_cast %170 : vector<1x8x8xf32> to vector<8x8xf32>
      %172 = vector.shape_cast %169 : vector<8x8xf32> to vector<1x8x8xf32>
      tpu.vector_store %arg22[%c3_108, %c0_109, %c0_110], %172 {strides = array<i32>} : memref<4x8x8xf32, #tpu.memory_space<vmem>>, vector<1x8x8xf32>,
    } else {
    }
    %c0_3 = arith.constant 0 : index
    %c0_4 = arith.constant 0 : index
    %5 = vector.load %arg5[%c0_3, %c0_4] : memref<32x32xf32, #tpu.memory_space<vmem>>, vector<32x32xf32>
    %cst = arith.constant dense<0.000000e+00> : vector<8x32xf32>
    %6 = tpu.matmul %1, %5, %cst {dimension_numbers = #tpu.dot_dimension_numbers<[1], [0], [0], [1], [0, 0, 1, 1], [], []>} : vector<8x32xf32>, vector<32x32xf32>, vector<8x32xf32> -> vector<8x32xf32>
    %c0_5 = arith.constant 0 : index
    %c0_6 = arith.constant 0 : index
    %7 = vector.load %arg6[%c0_5, %c0_6] : memref<1x32xf32, #tpu.memory_space<vmem>>, vector<1x32xf32>
    %8 = vector.broadcast %7 : vector<1x32xf32> to vector<8x32xf32>
    %9 = arith.addf %6, %8 : vector<8x32xf32>
    %10 = vector.extract_strided_slice %9 {offsets = [0, 0], sizes = [8, 8], strides = [1, 1]} : vector<8x32xf32> to vector<8x8xf32>
    %c0_7 = arith.constant 0 : index
    %c0_8 = arith.constant 0 : index
    %c0_9 = arith.constant 0 : index
    %11 = vector.load %arg20[%c0_7, %c0_8, %c0_9] : memref<4x8x8xf32, #tpu.memory_space<vmem>>, vector<1x8x8xf32>
    %12 = vector.shape_cast %11 : vector<1x8x8xf32> to vector<8x8xf32>
    %13 = vector.shape_cast %10 : vector<8x8xf32> to vector<1x8x8xf32>
    tpu.vector_store %arg20[%c0_7, %c0_8, %c0_9], %13 {strides = array<i32>} : memref<4x8x8xf32, #tpu.memory_space<vmem>>, vector<1x8x8xf32>,
    %14 = vector.extract_strided_slice %9 {offsets = [0, 8], sizes = [8, 8], strides = [1, 1]} : vector<8x32xf32> to vector<8x8xf32>
    %c1 = arith.constant 1 : index
    %c0_10 = arith.constant 0 : index
    %c0_11 = arith.constant 0 : index
    %15 = vector.load %arg20[%c1, %c0_10, %c0_11] : memref<4x8x8xf32, #tpu.memory_space<vmem>>, vector<1x8x8xf32>
    %16 = vector.shape_cast %15 : vector<1x8x8xf32> to vector<8x8xf32>
    %17 = vector.shape_cast %14 : vector<8x8xf32> to vector<1x8x8xf32>
    tpu.vector_store %arg20[%c1, %c0_10, %c0_11], %17 {strides = array<i32>} : memref<4x8x8xf32, #tpu.memory_space<vmem>>, vector<1x8x8xf32>,
    %18 = vector.extract_strided_slice %9 {offsets = [0, 16], sizes = [8, 8], strides = [1, 1]} : vector<8x32xf32> to vector<8x8xf32>
    %c2 = arith.constant 2 : index
    %c0_12 = arith.constant 0 : index
    %c0_13 = arith.constant 0 : index
    %19 = vector.load %arg20[%c2, %c0_12, %c0_13] : memref<4x8x8xf32, #tpu.memory_space<vmem>>, vector<1x8x8xf32>
    %20 = vector.shape_cast %19 : vector<1x8x8xf32> to vector<8x8xf32>
    %21 = vector.shape_cast %18 : vector<8x8xf32> to vector<1x8x8xf32>
    tpu.vector_store %arg20[%c2, %c0_12, %c0_13], %21 {strides = array<i32>} : memref<4x8x8xf32, #tpu.memory_space<vmem>>, vector<1x8x8xf32>,
    %22 = vector.extract_strided_slice %9 {offsets = [0, 24], sizes = [8, 8], strides = [1, 1]} : vector<8x32xf32> to vector<8x8xf32>
    %c3 = arith.constant 3 : index
    %c0_14 = arith.constant 0 : index
    %c0_15 = arith.constant 0 : index
    %23 = vector.load %arg20[%c3, %c0_14, %c0_15] : memref<4x8x8xf32, #tpu.memory_space<vmem>>, vector<1x8x8xf32>
    %24 = vector.shape_cast %23 : vector<1x8x8xf32> to vector<8x8xf32>
    %25 = vector.shape_cast %22 : vector<8x8xf32> to vector<1x8x8xf32>
    tpu.vector_store %arg20[%c3, %c0_14, %c0_15], %25 {strides = array<i32>} : memref<4x8x8xf32, #tpu.memory_space<vmem>>, vector<1x8x8xf32>,
    %c0_16 = arith.constant 0 : index
    %c0_17 = arith.constant 0 : index
    %c0_18 = arith.constant 0 : index
    %26 = vector.load %arg20[%c0_16, %c0_17, %c0_18] : memref<4x8x8xf32, #tpu.memory_space<vmem>>, vector<4x8x8xf32>
    %c0_19 = arith.constant 0 : index
    %c0_20 = arith.constant 0 : index
    %c0_21 = arith.constant 0 : index
    %27 = vector.load %arg21[%c0_19, %c0_20, %c0_21] : memref<4x8x8xf32, #tpu.memory_space<vmem>>, vector<4x8x8xf32>
    "tpu.trace_start"() <{level = 10 : i32, message = "hqd,hkd->hqk"}> : () -> ()
    %cst_22 = arith.constant dense<0.000000e+00> : vector<4x8x8xf32>
    %28 = tpu.matmul %26, %27, %cst_22 {dimension_numbers = #tpu.dot_dimension_numbers<[2], [2], [1], [1], [0, 0, 0, 1, 1, 1], [0], [0]>} : vector<4x8x8xf32>, vector<4x8x8xf32>, vector<4x8x8xf32> -> vector<4x8x8xf32>
    "tpu.trace_stop"() : () -> ()
    %c0_23 = arith.constant 0 : index
    %c0_24 = arith.constant 0 : index
    %c0_25 = arith.constant 0 : index
    %29 = vector.load %arg4[%c0_23, %c0_24, %c0_25] : memref<1x1x8xf32, #tpu.memory_space<vmem>>, vector<1x1x8xf32>
    %30 = vector.shape_cast %29 : vector<1x1x8xf32> to vector<1x8xf32>
    %cst_26 = arith.constant 0.000000e+00 : f32
    %31 = vector.broadcast %cst_26 : f32 to vector<1x8xf32>
    %32 = arith.cmpf oeq, %30, %31 : vector<1x8xf32>
    %cst_27 = arith.constant -1.000000e+30 : f32
    %cst_28 = arith.constant 0.000000e+00 : f32
    %33 = vector.broadcast %cst_27 : f32 to vector<1x8xf32>
    %34 = vector.broadcast %cst_28 : f32 to vector<1x8xf32>
    %35 = arith.select %32, %33, %34 : vector<1x8xi1>, vector<1x8xf32>
    %36 = vector.shape_cast %35 : vector<1x8xf32> to vector<1x1x8xf32>
    %37 = vector.broadcast %36 : vector<1x1x8xf32> to vector<4x8x8xf32>
    %38 = arith.addf %28, %37 : vector<4x8x8xf32>
    %cst_29 = arith.constant dense<0xFF800000> : vector<4x8xf32>
    %39 = vector.multi_reduction <maximumf>, %38, %cst_29 [2] : vector<4x8x8xf32> to vector<4x8xf32>
    %40 = vector.shape_cast %39 : vector<4x8xf32> to vector<4x8x1xf32>
    %41 = vector.broadcast %40 : vector<4x8x1xf32> to vector<4x8x8xf32>
    %42 = arith.subf %38, %41 : vector<4x8x8xf32>
    %43 = math.exp %42 : vector<4x8x8xf32>
    %cst_30 = arith.constant dense<0.000000e+00> : vector<4x8xf32>
    %44 = vector.multi_reduction <add>, %43, %cst_30 [2] : vector<4x8x8xf32> to vector<4x8xf32>
    %45 = vector.shape_cast %44 : vector<4x8xf32> to vector<4x8x1xf32>
    %46 = tpu.reciprocal %45 {approx = true} : vector<4x8x1xf32> -> vector<4x8x1xf32>
    %47 = vector.broadcast %46 : vector<4x8x1xf32> to vector<4x8x8xf32>
    %48 = arith.mulf %43, %47 : vector<4x8x8xf32>
    %c0_31 = arith.constant 0 : index
    %c0_32 = arith.constant 0 : index
    %c0_33 = arith.constant 0 : index
    %49 = vector.load %arg22[%c0_31, %c0_32, %c0_33] : memref<4x8x8xf32, #tpu.memory_space<vmem>>, vector<4x8x8xf32>
    "tpu.trace_start"() <{level = 10 : i32, message = "hqk,hkd->hqd"}> : () -> ()
    %cst_34 = arith.constant dense<0.000000e+00> : vector<4x8x8xf32>
    %50 = tpu.matmul %48, %49, %cst_34 {dimension_numbers = #tpu.dot_dimension_numbers<[2], [1], [1], [2], [0, 0, 0, 1, 1, 2], [0], [0]>} : vector<4x8x8xf32>, vector<4x8x8xf32>, vector<4x8x8xf32> -> vector<4x8x8xf32>
    "tpu.trace_stop"() : () -> ()
    %51 = vector.extract_strided_slice %50 {offsets = [0, 0, 0], sizes = [1, 8, 8], strides = [1, 1, 1]} : vector<4x8x8xf32> to vector<1x8x8xf32>
    %52 = vector.shape_cast %51 : vector<1x8x8xf32> to vector<8x8xf32>
    %c0_35 = arith.constant 0 : index
    %c0_36 = arith.constant 0 : index
    %53 = vector.load %arg23[%c0_35, %c0_36] : memref<8x32xf32, #tpu.memory_space<vmem>>, vector<8x8xf32>
    tpu.vector_store %arg23[%c0_35, %c0_36], %52 {strides = array<i32>} : memref<8x32xf32, #tpu.memory_space<vmem>>, vector<8x8xf32>,
    %54 = vector.extract_strided_slice %50 {offsets = [1, 0, 0], sizes = [1, 8, 8], strides = [1, 1, 1]} : vector<4x8x8xf32> to vector<1x8x8xf32>
    %55 = vector.shape_cast %54 : vector<1x8x8xf32> to vector<8x8xf32>
    %c0_37 = arith.constant 0 : index
    %c8 = arith.constant 8 : index
    %56 = vector.load %arg23[%c0_37, %c8] : memref<8x32xf32, #tpu.memory_space<vmem>>, vector<8x8xf32>
    tpu.vector_store %arg23[%c0_37, %c8], %55 {strides = array<i32>} : memref<8x32xf32, #tpu.memory_space<vmem>>, vector<8x8xf32>,
    %57 = vector.extract_strided_slice %50 {offsets = [2, 0, 0], sizes = [1, 8, 8], strides = [1, 1, 1]} : vector<4x8x8xf32> to vector<1x8x8xf32>
    %58 = vector.shape_cast %57 : vector<1x8x8xf32> to vector<8x8xf32>
    %c0_38 = arith.constant 0 : index
    %c16 = arith.constant 16 : index
    %59 = vector.load %arg23[%c0_38, %c16] : memref<8x32xf32, #tpu.memory_space<vmem>>, vector<8x8xf32>
    tpu.vector_store %arg23[%c0_38, %c16], %58 {strides = array<i32>} : memref<8x32xf32, #tpu.memory_space<vmem>>, vector<8x8xf32>,
    %60 = vector.extract_strided_slice %50 {offsets = [3, 0, 0], sizes = [1, 8, 8], strides = [1, 1, 1]} : vector<4x8x8xf32> to vector<1x8x8xf32>
    %61 = vector.shape_cast %60 : vector<1x8x8xf32> to vector<8x8xf32>
    %c0_39 = arith.constant 0 : index
    %c24 = arith.constant 24 : index
    %62 = vector.load %arg23[%c0_39, %c24] : memref<8x32xf32, #tpu.memory_space<vmem>>, vector<8x8xf32>
    tpu.vector_store %arg23[%c0_39, %c24], %61 {strides = array<i32>} : memref<8x32xf32, #tpu.memory_space<vmem>>, vector<8x8xf32>,
    %c0_40 = arith.constant 0 : index
    %c0_41 = arith.constant 0 : index
    %63 = vector.load %arg23[%c0_40, %c0_41] : memref<8x32xf32, #tpu.memory_space<vmem>>, vector<8x32xf32>
    %c0_42 = arith.constant 0 : index
    %c0_43 = arith.constant 0 : index
    %64 = vector.load %arg9[%c0_42, %c0_43] : memref<32x32xf32, #tpu.memory_space<vmem>>, vector<32x32xf32>
    %cst_44 = arith.constant dense<0.000000e+00> : vector<8x32xf32>
    %65 = tpu.matmul %63, %64, %cst_44 {dimension_numbers = #tpu.dot_dimension_numbers<[1], [0], [0], [1], [0, 0, 1, 1], [], []>} : vector<8x32xf32>, vector<32x32xf32>, vector<8x32xf32> -> vector<8x32xf32>
    %c0_45 = arith.constant 0 : index
    %c0_46 = arith.constant 0 : index
    %66 = vector.load %arg10[%c0_45, %c0_46] : memref<1x32xf32, #tpu.memory_space<vmem>>, vector<1x32xf32>
    %67 = vector.broadcast %66 : vector<1x32xf32> to vector<8x32xf32>
    %68 = arith.addf %65, %67 : vector<8x32xf32>
    %69 = arith.addf %1, %68 : vector<8x32xf32>
    %cst_47 = arith.constant dense<0.000000e+00> : vector<8xf32>
    %70 = vector.multi_reduction <add>, %69, %cst_47 [1] : vector<8x32xf32> to vector<8xf32>
    %71 = vector.shape_cast %70 : vector<8xf32> to vector<8x1xf32>
    %cst_48 = arith.constant 3.200000e+01 : f32
    %72 = vector.broadcast %cst_48 : f32 to vector<8x1xf32>
    %73 = arith.divf %71, %72 : vector<8x1xf32>
    %74 = vector.broadcast %73 : vector<8x1xf32> to vector<8x32xf32>
    %75 = arith.subf %69, %74 : vector<8x32xf32>
    %76 = arith.mulf %75, %75 : vector<8x32xf32>
    %cst_49 = arith.constant dense<0.000000e+00> : vector<8xf32>
    %77 = vector.multi_reduction <add>, %76, %cst_49 [1] : vector<8x32xf32> to vector<8xf32>
    %78 = vector.shape_cast %77 : vector<8xf32> to vector<8x1xf32>
    %cst_50 = arith.constant 3.200000e+01 : f32
    %79 = vector.broadcast %cst_50 : f32 to vector<8x1xf32>
    %80 = arith.divf %78, %79 : vector<8x1xf32>
    %81 = vector.broadcast %73 : vector<8x1xf32> to vector<8x32xf32>
    %82 = arith.subf %69, %81 : vector<8x32xf32>
    %cst_51 = arith.constant 9.99999974E-6 : f32
    %83 = vector.broadcast %cst_51 : f32 to vector<8x1xf32>
    %84 = arith.addf %80, %83 : vector<8x1xf32>
    %85 = math.rsqrt %84 : vector<8x1xf32>
    %86 = vector.broadcast %85 : vector<8x1xf32> to vector<8x32xf32>
    %87 = arith.mulf %82, %86 : vector<8x32xf32>
    %c0_52 = arith.constant 0 : index
    %c0_53 = arith.constant 0 : index
    %88 = vector.load %arg11[%c0_52, %c0_53] : memref<1x32xf32, #tpu.memory_space<vmem>>, vector<1x32xf32>
    %89 = vector.broadcast %88 : vector<1x32xf32> to vector<8x32xf32>
    %90 = arith.mulf %87, %89 : vector<8x32xf32>
    %c0_54 = arith.constant 0 : index
    %c0_55 = arith.constant 0 : index
    %91 = vector.load %arg12[%c0_54, %c0_55] : memref<1x32xf32, #tpu.memory_space<vmem>>, vector<1x32xf32>
    %92 = vector.broadcast %91 : vector<1x32xf32> to vector<8x32xf32>
    %93 = arith.addf %90, %92 : vector<8x32xf32>
    %c0_56 = arith.constant 0 : index
    %c0_57 = arith.constant 0 : index
    %94 = vector.load %arg13[%c0_56, %c0_57] : memref<32x128xf32, #tpu.memory_space<vmem>>, vector<32x128xf32>
    %cst_58 = arith.constant dense<0.000000e+00> : vector<8x128xf32>
    %95 = tpu.matmul %93, %94, %cst_58 {dimension_numbers = #tpu.dot_dimension_numbers<[1], [0], [0], [1], [0, 0, 1, 1], [], []>} : vector<8x32xf32>, vector<32x128xf32>, vector<8x128xf32> -> vector<8x128xf32>
    %c0_59 = arith.constant 0 : index
    %c0_60 = arith.constant 0 : index
    %96 = vector.load %arg14[%c0_59, %c0_60] : memref<1x128xf32, #tpu.memory_space<vmem>>, vector<1x128xf32>
    %97 = vector.broadcast %96 : vector<1x128xf32> to vector<8x128xf32>
    %98 = arith.addf %95, %97 : vector<8x128xf32>
    %cst_61 = arith.constant 0.000000e+00 : f32
    %99 = vector.broadcast %cst_61 : f32 to vector<8x128xf32>
    %100 = arith.maximumf %98, %99 : vector<8x128xf32>
    %c0_62 = arith.constant 0 : index
    %c0_63 = arith.constant 0 : index
    %101 = vector.load %arg15[%c0_62, %c0_63] : memref<128x32xf32, #tpu.memory_space<vmem>>, vector<128x32xf32>
    %cst_64 = arith.constant dense<0.000000e+00> : vector<8x32xf32>
    %102 = tpu.matmul %100, %101, %cst_64 {dimension_numbers = #tpu.dot_dimension_numbers<[1], [0], [0], [1], [0, 0, 1, 1], [], []>} : vector<8x128xf32>, vector<128x32xf32>, vector<8x32xf32> -> vector<8x32xf32>
    %c0_65 = arith.constant 0 : index
    %c0_66 = arith.constant 0 : index
    %103 = vector.load %arg16[%c0_65, %c0_66] : memref<1x32xf32, #tpu.memory_space<vmem>>, vector<1x32xf32>
    %104 = vector.broadcast %103 : vector<1x32xf32> to vector<8x32xf32>
    %105 = arith.addf %102, %104 : vector<8x32xf32>
    %106 = arith.addf %93, %105 : vector<8x32xf32>
    %cst_67 = arith.constant dense<0.000000e+00> : vector<8xf32>
    %107 = vector.multi_reduction <add>, %106, %cst_67 [1] : vector<8x32xf32> to vector<8xf32>
    %108 = vector.shape_cast %107 : vector<8xf32> to vector<8x1xf32>
    %cst_68 = arith.constant 3.200000e+01 : f32
    %109 = vector.broadcast %cst_68 : f32 to vector<8x1xf32>
    %110 = arith.divf %108, %109 : vector<8x1xf32>
    %111 = vector.broadcast %110 : vector<8x1xf32> to vector<8x32xf32>
    %112 = arith.subf %106, %111 : vector<8x32xf32>
    %113 = arith.mulf %112, %112 : vector<8x32xf32>
    %cst_69 = arith.constant dense<0.000000e+00> : vector<8xf32>
    %114 = vector.multi_reduction <add>, %113, %cst_69 [1] : vector<8x32xf32> to vector<8xf32>
    %115 = vector.shape_cast %114 : vector<8xf32> to vector<8x1xf32>
    %cst_70 = arith.constant 3.200000e+01 : f32
    %116 = vector.broadcast %cst_70 : f32 to vector<8x1xf32>
    %117 = arith.divf %115, %116 : vector<8x1xf32>
    %118 = vector.broadcast %110 : vector<8x1xf32> to vector<8x32xf32>
    %119 = arith.subf %106, %118 : vector<8x32xf32>
    %cst_71 = arith.constant 9.99999974E-6 : f32
    %120 = vector.broadcast %cst_71 : f32 to vector<8x1xf32>
    %121 = arith.addf %117, %120 : vector<8x1xf32>
    %122 = math.rsqrt %121 : vector<8x1xf32>
    %123 = vector.broadcast %122 : vector<8x1xf32> to vector<8x32xf32>
    %124 = arith.mulf %119, %123 : vector<8x32xf32>
    %c0_72 = arith.constant 0 : index
    %c0_73 = arith.constant 0 : index
    %125 = vector.load %arg17[%c0_72, %c0_73] : memref<1x32xf32, #tpu.memory_space<vmem>>, vector<1x32xf32>
    %126 = vector.broadcast %125 : vector<1x32xf32> to vector<8x32xf32>
    %127 = arith.mulf %124, %126 : vector<8x32xf32>
    %c0_74 = arith.constant 0 : index
    %c0_75 = arith.constant 0 : index
    %128 = vector.load %arg18[%c0_74, %c0_75] : memref<1x32xf32, #tpu.memory_space<vmem>>, vector<1x32xf32>
    %129 = vector.broadcast %128 : vector<1x32xf32> to vector<8x32xf32>
    %130 = arith.addf %127, %129 : vector<8x32xf32>
    %c0_76 = arith.constant 0 : index
    %c0_77 = arith.constant 0 : index
    %c0_78 = arith.constant 0 : index
    %131 = vector.load %arg19[%c0_76, %c0_77, %c0_78] : memref<1x8x32xf32, #tpu.memory_space<vmem>>, vector<1x8x32xf32>
    %132 = vector.shape_cast %131 : vector<1x8x32xf32> to vector<8x32xf32>
    %133 = vector.shape_cast %130 : vector<8x32xf32> to vector<1x8x32xf32>
    tpu.vector_store %arg19[%c0_76, %c0_77, %c0_78], %133 {strides = array<i32>} : memref<1x8x32xf32, #tpu.memory_space<vmem>>, vector<1x8x32xf32>,
    return
  }
  func.func @transform_0(%arg0: i32, %arg1: i32) -> (i32, i32, i32) {
    %c0_i32 = arith.constant 0 : i32
    %c0_i32_0 = arith.constant 0 : i32
    return %arg0, %arg1, %c0_i32 : i32, i32, i32
  }
  func.func @transform_1(%arg0: i32, %arg1: i32) -> (i32, i32, i32) {
    %c0_i32 = arith.constant 0 : i32
    %c0_i32_0 = arith.constant 0 : i32
    %c0_i32_1 = arith.constant 0 : i32
    return %arg0, %c0_i32, %c0_i32_0 : i32, i32, i32
  }
  func.func @transform_2(%arg0: i32, %arg1: i32) -> (i32, i32, i32) {
    %c0_i32 = arith.constant 0 : i32
    %c0_i32_0 = arith.constant 0 : i32
    %c0_i32_1 = arith.constant 0 : i32
    return %arg0, %c0_i32, %c0_i32_0 : i32, i32, i32
  }
  func.func @transform_3(%arg0: i32, %arg1: i32) -> (i32, i32) {
    %c0_i32 = arith.constant 0 : i32
    %c0_i32_0 = arith.constant 0 : i32
    %c0_i32_1 = arith.constant 0 : i32
    return %c0_i32, %c0_i32_0 : i32, i32
  }
  func.func @transform_4(%arg0: i32, %arg1: i32) -> (i32, i32) {
    %c0_i32 = arith.constant 0 : i32
    %c0_i32_0 = arith.constant 0 : i32
    %c0_i32_1 = arith.constant 0 : i32
    return %c0_i32, %c0_i32_0 : i32, i32
  }
  func.func @transform_5(%arg0: i32, %arg1: i32) -> (i32, i32) {
    %c0_i32 = arith.constant 0 : i32
    %c0_i32_0 = arith.constant 0 : i32
    %c0_i32_1 = arith.constant 0 : i32
    return %c0_i32, %c0_i32_0 : i32, i32
  }
  func.func @transform_6(%arg0: i32, %arg1: i32) -> (i32, i32) {
    %c0_i32 = arith.constant 0 : i32
    %c0_i32_0 = arith.constant 0 : i32
    %c0_i32_1 = arith.constant 0 : i32
    return %c0_i32, %c0_i32_0 : i32, i32
  }
  func.func @transform_7(%arg0: i32, %arg1: i32) -> (i32, i32) {
    %c0_i32 = arith.constant 0 : i32
    %c0_i32_0 = arith.constant 0 : i32
    %c0_i32_1 = arith.constant 0 : i32
    return %c0_i32, %c0_i32_0 : i32, i32
  }
  func.func @transform_8(%arg0: i32, %arg1: i32) -> (i32, i32) {
    %c0_i32 = arith.constant 0 : i32
    %c0_i32_0 = arith.constant 0 : i32
    %c0_i32_1 = arith.constant 0 : i32
    return %c0_i32, %c0_i32_0 : i32, i32
  }
  func.func @transform_9(%arg0: i32, %arg1: i32) -> (i32, i32) {
    %c0_i32 = arith.constant 0 : i32
    %c0_i32_0 = arith.constant 0 : i32
    %c0_i32_1 = arith.constant 0 : i32
    return %c0_i32, %c0_i32_0 : i32, i32
  }
  func.func @transform_10(%arg0: i32, %arg1: i32) -> (i32, i32) {
    %c0_i32 = arith.constant 0 : i32
    %c0_i32_0 = arith.constant 0 : i32
    %c0_i32_1 = arith.constant 0 : i32
    return %c0_i32, %c0_i32_0 : i32, i32
  }
  func.func @transform_11(%arg0: i32, %arg1: i32) -> (i32, i32) {
    %c0_i32 = arith.constant 0 : i32
    %c0_i32_0 = arith.constant 0 : i32
    %c0_i32_1 = arith.constant 0 : i32
    return %c0_i32, %c0_i32_0 : i32, i32
  }
  func.func @transform_12(%arg0: i32, %arg1: i32) -> (i32, i32) {
    %c0_i32 = arith.constant 0 : i32
    %c0_i32_0 = arith.constant 0 : i32
    %c0_i32_1 = arith.constant 0 : i32
    return %c0_i32, %c0_i32_0 : i32, i32
  }
  func.func @transform_13(%arg0: i32, %arg1: i32) -> (i32, i32) {
    %c0_i32 = arith.constant 0 : i32
    %c0_i32_0 = arith.constant 0 : i32
    %c0_i32_1 = arith.constant 0 : i32
    return %c0_i32, %c0_i32_0 : i32, i32
  }
  func.func @transform_14(%arg0: i32, %arg1: i32) -> (i32, i32) {
    %c0_i32 = arith.constant 0 : i32
    %c0_i32_0 = arith.constant 0 : i32
    %c0_i32_1 = arith.constant 0 : i32
    return %c0_i32, %c0_i32_0 : i32, i32
  }
  func.func @transform_15(%arg0: i32, %arg1: i32) -> (i32, i32) {
    %c0_i32 = arith.constant 0 : i32
    %c0_i32_0 = arith.constant 0 : i32
    %c0_i32_1 = arith.constant 0 : i32
    return %c0_i32, %c0_i32_0 : i32, i32
  }
  func.func @transform_16(%arg0: i32, %arg1: i32) -> (i32, i32) {
    %c0_i32 = arith.constant 0 : i32
    %c0_i32_0 = arith.constant 0 : i32
    %c0_i32_1 = arith.constant 0 : i32
    return %c0_i32, %c0_i32_0 : i32, i32
  }
  func.func @transform_17(%arg0: i32, %arg1: i32) -> (i32, i32, i32) {
    %c0_i32 = arith.constant 0 : i32
    %c0_i32_0 = arith.constant 0 : i32
    return %arg0, %arg1, %c0_i32 : i32, i32, i32
  }
}

module attributes {stable_mosaic.version = 11 : i64} {
  func.func @_block_kernel(%arg0: i32, %arg1: i32, %arg2: memref<1x8x32xf32, #tpu.memory_space<vmem>>, %arg3: memref<1x8x32xf32, #tpu.memory_space<vmem>>, %arg4: memref<1x1x8xf32, #tpu.memory_space<vmem>>, %arg5: memref<32x32xf32, #tpu.memory_space<vmem>>, %arg6: memref<1x32xf32, #tpu.memory_space<vmem>>, %arg7: memref<32x64xf32, #tpu.memory_space<vmem>>, %arg8: memref<1x64xf32, #tpu.memory_space<vmem>>, %arg9: memref<32x32xf32, #tpu.memory_space<vmem>>, %arg10: memref<1x32xf32, #tpu.memory_space<vmem>>, %arg11: memref<1x32xf32, #tpu.memory_space<vmem>>, %arg12: memref<1x32xf32, #tpu.memory_space<vmem>>, %arg13: memref<32x128xf32, #tpu.memory_space<vmem>>, %arg14: memref<1x128xf32, #tpu.memory_space<vmem>>, %arg15: memref<128x32xf32, #tpu.memory_space<vmem>>, %arg16: memref<1x32xf32, #tpu.memory_space<vmem>>, %arg17: memref<1x32xf32, #tpu.memory_space<vmem>>, %arg18: memref<1x32xf32, #tpu.memory_space<vmem>>, %arg19: memref<1x8x32xf32, #tpu.memory_space<vmem>>, %arg20: memref<4x8x8xf32, #tpu.memory_space<vmem>>, %arg21: memref<4x8x8xf32, #tpu.memory_space<vmem>>, %arg22: memref<4x8x8xf32, #tpu.memory_space<vmem>>, %arg23: memref<8x32xf32, #tpu.memory_space<vmem>>) attributes {dimension_semantics = [#tpu.dimension_semantics<parallel>, #tpu.dimension_semantics<arbitrary>], iteration_bounds = array<i64: 2, 1>, scalar_prefetch = 0 : i64, scratch_operands = 4 : i64, tpu.core_type = #tpu.core_type<tc>, window_params = [{transform_indices = @transform_0, window_bounds = array<i64: 1, 8, 32>}, {transform_indices = @transform_1, window_bounds = array<i64: 1, 8, 32>}, {transform_indices = @transform_2, window_bounds = array<i64: 1, 1, 8>}, {pipeline_mode = #tpu.pipeline_mode<synchronous>, transform_indices = @transform_3, window_bounds = array<i64: 32, 32>}, {pipeline_mode = #tpu.pipeline_mode<synchronous>, transform_indices = @transform_4, window_bounds = array<i64: 1, 32>}, {pipeline_mode = #tpu.pipeline_mode<synchronous>, transform_indices = @transform_5, window_bounds = array<i64: 32, 64>}, {pipeline_mode = #tpu.pipeline_mode<synchronous>, transform_indices = @transform_6, window_bounds = array<i64: 1, 64>}, {pipeline_mode = #tpu.pipeline_mode<synchronous>, transform_indices = @transform_7, window_bounds = array<i64: 32, 32>}, {pipeline_mode = #tpu.pipeline_mode<synchronous>, transform_indices = @transform_8, window_bounds = array<i64: 1, 32>}, {pipeline_mode = #tpu.pipeline_mode<synchronous>, transform_indices = @transform_9, window_bounds = array<i64: 1, 32>}, {pipeline_mode = #tpu.pipeline_mode<synchronous>, transform_indices = @transform_10, window_bounds = array<i64: 1, 32>}, {pipeline_mode = #tpu.pipeline_mode<synchronous>, transform_indices = @transform_11, window_bounds = array<i64: 32, 128>}, {pipeline_mode = #tpu.pipeline_mode<synchronous>, transform_indices = @transform_12, window_bounds = array<i64: 1, 128>}, {pipeline_mode = #tpu.pipeline_mode<synchronous>, transform_indices = @transform_13, window_bounds = array<i64: 128, 32>}, {pipeline_mode = #tpu.pipeline_mode<synchronous>, transform_indices = @transform_14, window_bounds = array<i64: 1, 32>}, {pipeline_mode = #tpu.pipeline_mode<synchronous>, transform_indices = @transform_15, window_bounds = array<i64: 1, 32>}, {pipeline_mode = #tpu.pipeline_mode<synchronous>, transform_indices = @transform_16, window_bounds = array<i64: 1, 32>}, {transform_indices = @transform_17, window_bounds = array<i64: 1, 8, 32>}]} {
    %c0 = arith.constant 0 : index
    %c0_0 = arith.constant 0 : index
    %c0_1 = arith.constant 0 : index
    %0 = vector.load %arg2[%c0, %c0_0, %c0_1] : memref<1x8x32xf32, #tpu.memory_space<vmem>>, vector<1x8x32xf32>
    %1 = vector.shape_cast %0 : vector<1x8x32xf32> to vector<8x32xf32>
    %c0_i32 = arith.constant 0 : i32
    %2 = arith.cmpi eq, %arg1, %c0_i32 : i32
    %3 = arith.extui %2 : i1 to i32
    %c0_i32_2 = arith.constant 0 : i32
    %4 = arith.cmpi ne, %3, %c0_i32_2 : i32
    scf.if %4 {
      %c0_79 = arith.constant 0 : index
      %c0_80 = arith.constant 0 : index
      %c0_81 = arith.constant 0 : index
      %134 = vector.load %arg3[%c0_79, %c0_80, %c0_81] : memref<1x8x32xf32, #tpu.memory_space<vmem>>, vector<1x8x32xf32>
      %135 = vector.shape_cast %134 : vector<1x8x32xf32> to vector<8x32xf32>
      %c0_82 = arith.constant 0 : index
      %c0_83 = arith.constant 0 : index
      %136 = vector.load %arg7[%c0_82, %c0_83] : memref<32x64xf32, #tpu.memory_space<vmem>>, vector<32x64xf32>
      %cst_84 = arith.constant dense<0.000000e+00> : vector<8x64xf32>
      %137 = tpu.matmul %135, %136, %cst_84 {dimension_numbers = #tpu.dot_dimension_numbers<[1], [0], [0], [1], [0, 0, 1, 1], [], []>} : vector<8x32xf32>, vector<32x64xf32>, vector<8x64xf32> -> vector<8x64xf32>
      %c0_85 = arith.constant 0 : index
      %c0_86 = arith.constant 0 : index
      %138 = vector.load %arg8[%c0_85, %c0_86] : memref<1x64xf32, #tpu.memory_space<vmem>>, vector<1x64xf32>
      %139 = vector.broadcast %138 : vector<1x64xf32> to vector<8x64xf32>
      %140 = arith.addf %137, %139 : vector<8x64xf32>
      %141 = vector.extract_strided_slice %140 {offsets = [0, 0], sizes = [8, 8], strides = [1, 1]} : vector<8x64xf32> to vector<8x8xf32>
      %c0_87 = arith.constant 0 : index
      %c0_88 = arith.constant 0 : index
      %c0_89 = arith.constant 0 : index
      %142 = vector.load %arg21[%c0_87, %c0_88, %c0_89] : memref<4x8x8xf32, #tpu.memory_space<vmem>>, vector<1x8x8xf32>
      %143 = vector.shape_cast %142 : vector<1x8x8xf32> to vector<8x8xf32>
      %144 = vector.shape_cast %141 : vector<8x8xf32> to vector<1x8x8xf32>
      tpu.vector_store %arg21[%c0_87, %c0_88, %c0_89], %144 {strides = array<i32>} : memref<4x8x8xf32, #tpu.memory_space<vmem>>, vector<1x8x8xf32>,
      %145 = vector.extract_strided_slice %140 {offsets = [0, 32], sizes = [8, 8], strides = [1, 1]} : vector<8x64xf32> to vector<8x8xf32>
      %c0_90 = arith.constant 0 : index
      %c0_91 = arith.constant 0 : index
      %c0_92 = arith.constant 0 : index
      %146 = vector.load %arg22[%c0_90, %c0_91, %c0_92] : memref<4x8x8xf32, #tpu.memory_space<vmem>>, vector<1x8x8xf32>
      %147 = vector.shape_cast %146 : vector<1x8x8xf32> to vector<8x8xf32>
      %148 = vector.shape_cast %145 : vector<8x8xf32> to vector<1x8x8xf32>
      tpu.vector_store %arg22[%c0_90, %c0_91, %c0_92], %148 {strides = array<i32>} : memref<4x8x8xf32, #tpu.memory_space<vmem>>, vector<1x8x8xf32>,
      %149 = vector.extract_strided_slice %140 {offsets = [0, 8], sizes = [8, 8], strides = [1, 1]} : vector<8x64xf32> to vector<8x8xf32>
      %c1_93 = arith.constant 1 : index
      %c0_94 = arith.constant 0 : index
      %c0_95 = arith.constant 0 : index
      %150 = vector.load %arg21[%c1_93, %c0_94, %c0_95] : memref<4x8x8xf32, #tpu.memory_space<vmem>>, vector<1x8x8xf32>
      %151 = vector.shape_cast %150 : vector<1x8x8xf32> to vector<8x8xf32>
      %152 = vector.shape_cast %149 : vector<8x8xf32> to vector<1x8x8xf32>
      tpu.vector_store %arg21[%c1_93, %c0_94, %c0_95], %152 {strides = array<i32>} : memref<4x8x8xf32, #tpu.memory_space<vmem>>, vector<1x8x8xf32>,
      %153 = vector.extract_strided_slice %140 {offsets = [0, 40], sizes = [8, 8], strides = [1, 1]} : vector<8x64xf32> to vector<8x8xf32>
      %c1_96 = arith.constant 1 : index
      %c0_97 = arith.constant 0 : index
      %c0_98 = arith.constant 0 : index
      %154 = vector.load %arg22[%c1_96, %c0_97, %c0_98] : memref<4x8x8xf32, #tpu.memory_space<vmem>>, vector<1x8x8xf32>
      %155 = vector.shape_cast %154 : vector<1x8x8xf32> to vector<8x8xf32>
      %156 = vector.shape_cast %153 : vector<8x8xf32> to vector<1x8x8xf32>
      tpu.vector_store %arg22[%c1_96, %c0_97, %c0_98], %156 {strides = array<i32>} : memref<4x8x8xf32, #tpu.memory_space<vmem>>, vector<1x8x8xf32>,
      %157 = vector.extract_strided_slice %140 {offsets = [0, 16], sizes = [8, 8], strides = [1, 1]} : vector<8x64xf32> to vector<8x8xf32>
      %c2_99 = arith.constant 2 : index
      %c0_100 = arith.constant 0 : index
      %c0_101 = arith.constant 0 : index
      %158 = vector.load %arg21[%c2_99, %c0_100, %c0_101] : memref<4x8x8xf32, #tpu.memory_space<vmem>>, vector<1x8x8xf32>
      %159 = vector.shape_cast %158 : vector<1x8x8xf32> to vector<8x8xf32>
      %160 = vector.shape_cast %157 : vector<8x8xf32> to vector<1x8x8xf32>
      tpu.vector_store %arg21[%c2_99, %c0_100, %c0_101], %160 {strides = array<i32>} : memref<4x8x8xf32, #tpu.memory_space<vmem>>, vector<1x8x8xf32>,
      %161 = vector.extract_strided_slice %140 {offsets = [0, 48], sizes = [8, 8], strides = [1, 1]} : vector<8x64xf32> to vector<8x8xf32>
      %c2_102 = arith.constant 2 : index
      %c0_103 = arith.constant 0 : index
      %c0_104 = arith.constant 0 : index
      %162 = vector.load %arg22[%c2_102, %c0_103, %c0_104] : memref<4x8x8xf32, #tpu.memory_space<vmem>>, vector<1x8x8xf32>
      %163 = vector.shape_cast %162 : vector<1x8x8xf32> to vector<8x8xf32>
      %164 = vector.shape_cast %161 : vector<8x8xf32> to vector<1x8x8xf32>
      tpu.vector_store %arg22[%c2_102, %c0_103, %c0_104], %164 {strides = array<i32>} : memref<4x8x8xf32, #tpu.memory_space<vmem>>, vector<1x8x8xf32>,
      %165 = vector.extract_strided_slice %140 {offsets = [0, 24], sizes = [8, 8], strides = [1, 1]} : vector<8x64xf32> to vector<8x8xf32>
      %c3_105 = arith.constant 3 : index
      %c0_106 = arith.constant 0 : index
      %c0_107 = arith.constant 0 : index
      %166 = vector.load %arg21[%c3_105, %c0_106, %c0_107] : memref<4x8x8xf32, #tpu.memory_space<vmem>>, vector<1x8x8xf32>
      %167 = vector.shape_cast %166 : vector<1x8x8xf32> to vector<8x8xf32>
      %168 = vector.shape_cast %165 : vector<8x8xf32> to vector<1x8x8xf32>
      tpu.vector_store %arg21[%c3_105, %c0_106, %c0_107], %168 {strides = array<i32>} : memref<4x8x8xf32, #tpu.memory_space<vmem>>, vector<1x8x8xf32>,
      %169 = vector.extract_strided_slice %140 {offsets = [0, 56], sizes = [8, 8], strides = [1, 1]} : vector<8x64xf32> to vector<8x8xf32>
      %c3_108 = arith.constant 3 : index
      %c0_109 = arith.constant 0 : index
      %c0_110 = arith.constant 0 : index
      %170 = vector.load %arg22[%c3_108, %c0_109, %c0_110] : memref<4x8x8xf32, #tpu.memory_space<vmem>>, vector<1x8x8xf32>
      %171 = vector.shape_cast %170 : vector<1x8x8xf32> to vector<8x8xf32>
      %172 = vector.shape_cast %169 : vector<8x8xf32> to vector<1x8x8xf32>
      tpu.vector_store %arg22[%c3_108, %c0_109, %c0_110], %172 {strides = array<i32>} : memref<4x8x8xf32, #tpu.memory_space<vmem>>, vector<1x8x8xf32>,
    } else {
    }
    %c0_3 = arith.constant 0 : index
    %c0_4 = arith.constant 0 : index
    %5 = vector.load %arg5[%c0_3, %c0_4] : memref<32x32xf32, #tpu.memory_space<vmem>>, vector<32x32xf32>
    %cst = arith.constant dense<0.000000e+00> : vector<8x32xf32>
    %6 = tpu.matmul %1, %5, %cst {dimension_numbers = #tpu.dot_dimension_numbers<[1], [0], [0], [1], [0, 0, 1, 1], [], []>} : vector<8x32xf32>, vector<32x32xf32>, vector<8x32xf32> -> vector<8x32xf32>
    %c0_5 = arith.constant 0 : index
    %c0_6 = arith.constant 0 : index
    %7 = vector.load %arg6[%c0_5, %c0_6] : memref<1x32xf32, #tpu.memory_space<vmem>>, vector<1x32xf32>
    %8 = vector.broadcast %7 : vector<1x32xf32> to vector<8x32xf32>
    %9 = arith.addf %6, %8 : vector<8x32xf32>
    %10 = vector.extract_strided_slice %9 {offsets = [0, 0], sizes = [8, 8], strides = [1, 1]} : vector<8x32xf32> to vector<8x8xf32>
    %c0_7 = arith.constant 0 : index
    %c0_8 = arith.constant 0 : index
    %c0_9 = arith.constant 0 : index
    %11 = vector.load %arg20[%c0_7, %c0_8, %c0_9] : memref<4x8x8xf32, #tpu.memory_space<vmem>>, vector<1x8x8xf32>
    %12 = vector.shape_cast %11 : vector<1x8x8xf32> to vector<8x8xf32>
    %13 = vector.shape_cast %10 : vector<8x8xf32> to vector<1x8x8xf32>
    tpu.vector_store %arg20[%c0_7, %c0_8, %c0_9], %13 {strides = array<i32>} : memref<4x8x8xf32, #tpu.memory_space<vmem>>, vector<1x8x8xf32>,
    %14 = vector.extract_strided_slice %9 {offsets = [0, 8], sizes = [8, 8], strides = [1, 1]} : vector<8x32xf32> to vector<8x8xf32>
    %c1 = arith.constant 1 : index
    %c0_10 = arith.constant 0 : index
    %c0_11 = arith.constant 0 : index
    %15 = vector.load %arg20[%c1, %c0_10, %c0_11] : memref<4x8x8xf32, #tpu.memory_space<vmem>>, vector<1x8x8xf32>
    %16 = vector.shape_cast %15 : vector<1x8x8xf32> to vector<8x8xf32>
    %17 = vector.shape_cast %14 : vector<8x8xf32> to vector<1x8x8xf32>
    tpu.vector_store %arg20[%c1, %c0_10, %c0_11], %17 {strides = array<i32>} : memref<4x8x8xf32, #tpu.memory_space<vmem>>, vector<1x8x8xf32>,
    %18 = vector.extract_strided_slice %9 {offsets = [0, 16], sizes = [8, 8], strides = [1, 1]} : vector<8x32xf32> to vector<8x8xf32>
    %c2 = arith.constant 2 : index
    %c0_12 = arith.constant 0 : index
    %c0_13 = arith.constant 0 : index
    %19 = vector.load %arg20[%c2, %c0_12, %c0_13] : memref<4x8x8xf32, #tpu.memory_space<vmem>>, vector<1x8x8xf32>
    %20 = vector.shape_cast %19 : vector<1x8x8xf32> to vector<8x8xf32>
    %21 = vector.shape_cast %18 : vector<8x8xf32> to vector<1x8x8xf32>
    tpu.vector_store %arg20[%c2, %c0_12, %c0_13], %21 {strides = array<i32>} : memref<4x8x8xf32, #tpu.memory_space<vmem>>, vector<1x8x8xf32>,
    %22 = vector.extract_strided_slice %9 {offsets = [0, 24], sizes = [8, 8], strides = [1, 1]} : vector<8x32xf32> to vector<8x8xf32>
    %c3 = arith.constant 3 : index
    %c0_14 = arith.constant 0 : index
    %c0_15 = arith.constant 0 : index
    %23 = vector.load %arg20[%c3, %c0_14, %c0_15] : memref<4x8x8xf32, #tpu.memory_space<vmem>>, vector<1x8x8xf32>
    %24 = vector.shape_cast %23 : vector<1x8x8xf32> to vector<8x8xf32>
    %25 = vector.shape_cast %22 : vector<8x8xf32> to vector<1x8x8xf32>
    tpu.vector_store %arg20[%c3, %c0_14, %c0_15], %25 {strides = array<i32>} : memref<4x8x8xf32, #tpu.memory_space<vmem>>, vector<1x8x8xf32>,
    %c0_16 = arith.constant 0 : index
    %c0_17 = arith.constant 0 : index
    %c0_18 = arith.constant 0 : index
    %26 = vector.load %arg20[%c0_16, %c0_17, %c0_18] : memref<4x8x8xf32, #tpu.memory_space<vmem>>, vector<4x8x8xf32>
    %c0_19 = arith.constant 0 : index
    %c0_20 = arith.constant 0 : index
    %c0_21 = arith.constant 0 : index
    %27 = vector.load %arg21[%c0_19, %c0_20, %c0_21] : memref<4x8x8xf32, #tpu.memory_space<vmem>>, vector<4x8x8xf32>
    "tpu.trace_start"() <{level = 10 : i32, message = "hqd,hkd->hqk"}> : () -> ()
    %cst_22 = arith.constant dense<0.000000e+00> : vector<4x8x8xf32>
    %28 = tpu.matmul %26, %27, %cst_22 {dimension_numbers = #tpu.dot_dimension_numbers<[2], [2], [1], [1], [0, 0, 0, 1, 1, 1], [0], [0]>} : vector<4x8x8xf32>, vector<4x8x8xf32>, vector<4x8x8xf32> -> vector<4x8x8xf32>
    "tpu.trace_stop"() : () -> ()
    %c0_23 = arith.constant 0 : index
    %c0_24 = arith.constant 0 : index
    %c0_25 = arith.constant 0 : index
    %29 = vector.load %arg4[%c0_23, %c0_24, %c0_25] : memref<1x1x8xf32, #tpu.memory_space<vmem>>, vector<1x1x8xf32>
    %30 = vector.shape_cast %29 : vector<1x1x8xf32> to vector<1x8xf32>
    %cst_26 = arith.constant 0.000000e+00 : f32
    %31 = vector.broadcast %cst_26 : f32 to vector<1x8xf32>
    %32 = arith.cmpf oeq, %30, %31 : vector<1x8xf32>
    %cst_27 = arith.constant -1.000000e+30 : f32
    %cst_28 = arith.constant 0.000000e+00 : f32
    %33 = vector.broadcast %cst_27 : f32 to vector<1x8xf32>
    %34 = vector.broadcast %cst_28 : f32 to vector<1x8xf32>
    %35 = arith.select %32, %33, %34 : vector<1x8xi1>, vector<1x8xf32>
    %36 = vector.shape_cast %35 : vector<1x8xf32> to vector<1x1x8xf32>
    %37 = vector.broadcast %36 : vector<1x1x8xf32> to vector<4x8x8xf32>
    %38 = arith.addf %28, %37 : vector<4x8x8xf32>
    %cst_29 = arith.constant dense<0xFF800000> : vector<4x8xf32>
    %39 = vector.multi_reduction <maximumf>, %38, %cst_29 [2] : vector<4x8x8xf32> to vector<4x8xf32>
    %40 = vector.shape_cast %39 : vector<4x8xf32> to vector<4x8x1xf32>
    %41 = vector.broadcast %40 : vector<4x8x1xf32> to vector<4x8x8xf32>
    %42 = arith.subf %38, %41 : vector<4x8x8xf32>
    %43 = math.exp %42 : vector<4x8x8xf32>
    %cst_30 = arith.constant dense<0.000000e+00> : vector<4x8xf32>
    %44 = vector.multi_reduction <add>, %43, %cst_30 [2] : vector<4x8x8xf32> to vector<4x8xf32>
    %45 = vector.shape_cast %44 : vector<4x8xf32> to vector<4x8x1xf32>
    %46 = tpu.reciprocal %45 {approx = true} : vector<4x8x1xf32> -> vector<4x8x1xf32>
    %47 = vector.broadcast %46 : vector<4x8x1xf32> to vector<4x8x8xf32>
    %48 = arith.mulf %43, %47 : vector<4x8x8xf32>
    %c0_31 = arith.constant 0 : index
    %c0_32 = arith.constant 0 : index
    %c0_33 = arith.constant 0 : index
    %49 = vector.load %arg22[%c0_31, %c0_32, %c0_33] : memref<4x8x8xf32, #tpu.memory_space<vmem>>, vector<4x8x8xf32>
    "tpu.trace_start"() <{level = 10 : i32, message = "hqk,hkd->hqd"}> : () -> ()
    %cst_34 = arith.constant dense<0.000000e+00> : vector<4x8x8xf32>
    %50 = tpu.matmul %48, %49, %cst_34 {dimension_numbers = #tpu.dot_dimension_numbers<[2], [1], [1], [2], [0, 0, 0, 1, 1, 2], [0], [0]>} : vector<4x8x8xf32>, vector<4x8x8xf32>, vector<4x8x8xf32> -> vector<4x8x8xf32>
    "tpu.trace_stop"() : () -> ()
    %51 = vector.extract_strided_slice %50 {offsets = [0, 0, 0], sizes = [1, 8, 8], strides = [1, 1, 1]} : vector<4x8x8xf32> to vector<1x8x8xf32>
    %52 = vector.shape_cast %51 : vector<1x8x8xf32> to vector<8x8xf32>
    %c0_35 = arith.constant 0 : index
    %c0_36 = arith.constant 0 : index
    %53 = vector.load %arg23[%c0_35, %c0_36] : memref<8x32xf32, #tpu.memory_space<vmem>>, vector<8x8xf32>
    tpu.vector_store %arg23[%c0_35, %c0_36], %52 {strides = array<i32>} : memref<8x32xf32, #tpu.memory_space<vmem>>, vector<8x8xf32>,
    %54 = vector.extract_strided_slice %50 {offsets = [1, 0, 0], sizes = [1, 8, 8], strides = [1, 1, 1]} : vector<4x8x8xf32> to vector<1x8x8xf32>
    %55 = vector.shape_cast %54 : vector<1x8x8xf32> to vector<8x8xf32>
    %c0_37 = arith.constant 0 : index
    %c8 = arith.constant 8 : index
    %56 = vector.load %arg23[%c0_37, %c8] : memref<8x32xf32, #tpu.memory_space<vmem>>, vector<8x8xf32>
    tpu.vector_store %arg23[%c0_37, %c8], %55 {strides = array<i32>} : memref<8x32xf32, #tpu.memory_space<vmem>>, vector<8x8xf32>,
    %57 = vector.extract_strided_slice %50 {offsets = [2, 0, 0], sizes = [1, 8, 8], strides = [1, 1, 1]} : vector<4x8x8xf32> to vector<1x8x8xf32>
    %58 = vector.shape_cast %57 : vector<1x8x8xf32> to vector<8x8xf32>
    %c0_38 = arith.constant 0 : index
    %c16 = arith.constant 16 : index
    %59 = vector.load %arg23[%c0_38, %c16] : memref<8x32xf32, #tpu.memory_space<vmem>>, vector<8x8xf32>
    tpu.vector_store %arg23[%c0_38, %c16], %58 {strides = array<i32>} : memref<8x32xf32, #tpu.memory_space<vmem>>, vector<8x8xf32>,
    %60 = vector.extract_strided_slice %50 {offsets = [3, 0, 0], sizes = [1, 8, 8], strides = [1, 1, 1]} : vector<4x8x8xf32> to vector<1x8x8xf32>
    %61 = vector.shape_cast %60 : vector<1x8x8xf32> to vector<8x8xf32>
    %c0_39 = arith.constant 0 : index
    %c24 = arith.constant 24 : index
    %62 = vector.load %arg23[%c0_39, %c24] : memref<8x32xf32, #tpu.memory_space<vmem>>, vector<8x8xf32>
    tpu.vector_store %arg23[%c0_39, %c24], %61 {strides = array<i32>} : memref<8x32xf32, #tpu.memory_space<vmem>>, vector<8x8xf32>,
    %c0_40 = arith.constant 0 : index
    %c0_41 = arith.constant 0 : index
    %63 = vector.load %arg23[%c0_40, %c0_41] : memref<8x32xf32, #tpu.memory_space<vmem>>, vector<8x32xf32>
    %c0_42 = arith.constant 0 : index
    %c0_43 = arith.constant 0 : index
    %64 = vector.load %arg9[%c0_42, %c0_43] : memref<32x32xf32, #tpu.memory_space<vmem>>, vector<32x32xf32>
    %cst_44 = arith.constant dense<0.000000e+00> : vector<8x32xf32>
    %65 = tpu.matmul %63, %64, %cst_44 {dimension_numbers = #tpu.dot_dimension_numbers<[1], [0], [0], [1], [0, 0, 1, 1], [], []>} : vector<8x32xf32>, vector<32x32xf32>, vector<8x32xf32> -> vector<8x32xf32>
    %c0_45 = arith.constant 0 : index
    %c0_46 = arith.constant 0 : index
    %66 = vector.load %arg10[%c0_45, %c0_46] : memref<1x32xf32, #tpu.memory_space<vmem>>, vector<1x32xf32>
    %67 = vector.broadcast %66 : vector<1x32xf32> to vector<8x32xf32>
    %68 = arith.addf %65, %67 : vector<8x32xf32>
    %69 = arith.addf %1, %68 : vector<8x32xf32>
    %cst_47 = arith.constant dense<0.000000e+00> : vector<8xf32>
    %70 = vector.multi_reduction <add>, %69, %cst_47 [1] : vector<8x32xf32> to vector<8xf32>
    %71 = vector.shape_cast %70 : vector<8xf32> to vector<8x1xf32>
    %cst_48 = arith.constant 3.200000e+01 : f32
    %72 = vector.broadcast %cst_48 : f32 to vector<8x1xf32>
    %73 = arith.divf %71, %72 : vector<8x1xf32>
    %74 = vector.broadcast %73 : vector<8x1xf32> to vector<8x32xf32>
    %75 = arith.subf %69, %74 : vector<8x32xf32>
    %76 = arith.mulf %75, %75 : vector<8x32xf32>
    %cst_49 = arith.constant dense<0.000000e+00> : vector<8xf32>
    %77 = vector.multi_reduction <add>, %76, %cst_49 [1] : vector<8x32xf32> to vector<8xf32>
    %78 = vector.shape_cast %77 : vector<8xf32> to vector<8x1xf32>
    %cst_50 = arith.constant 3.200000e+01 : f32
    %79 = vector.broadcast %cst_50 : f32 to vector<8x1xf32>
    %80 = arith.divf %78, %79 : vector<8x1xf32>
    %81 = vector.broadcast %73 : vector<8x1xf32> to vector<8x32xf32>
    %82 = arith.subf %69, %81 : vector<8x32xf32>
    %cst_51 = arith.constant 9.99999974E-6 : f32
    %83 = vector.broadcast %cst_51 : f32 to vector<8x1xf32>
    %84 = arith.addf %80, %83 : vector<8x1xf32>
    %85 = math.rsqrt %84 : vector<8x1xf32>
    %86 = vector.broadcast %85 : vector<8x1xf32> to vector<8x32xf32>
    %87 = arith.mulf %82, %86 : vector<8x32xf32>
    %c0_52 = arith.constant 0 : index
    %c0_53 = arith.constant 0 : index
    %88 = vector.load %arg11[%c0_52, %c0_53] : memref<1x32xf32, #tpu.memory_space<vmem>>, vector<1x32xf32>
    %89 = vector.broadcast %88 : vector<1x32xf32> to vector<8x32xf32>
    %90 = arith.mulf %87, %89 : vector<8x32xf32>
    %c0_54 = arith.constant 0 : index
    %c0_55 = arith.constant 0 : index
    %91 = vector.load %arg12[%c0_54, %c0_55] : memref<1x32xf32, #tpu.memory_space<vmem>>, vector<1x32xf32>
    %92 = vector.broadcast %91 : vector<1x32xf32> to vector<8x32xf32>
    %93 = arith.addf %90, %92 : vector<8x32xf32>
    %c0_56 = arith.constant 0 : index
    %c0_57 = arith.constant 0 : index
    %94 = vector.load %arg13[%c0_56, %c0_57] : memref<32x128xf32, #tpu.memory_space<vmem>>, vector<32x128xf32>
    %cst_58 = arith.constant dense<0.000000e+00> : vector<8x128xf32>
    %95 = tpu.matmul %93, %94, %cst_58 {dimension_numbers = #tpu.dot_dimension_numbers<[1], [0], [0], [1], [0, 0, 1, 1], [], []>} : vector<8x32xf32>, vector<32x128xf32>, vector<8x128xf32> -> vector<8x128xf32>
    %c0_59 = arith.constant 0 : index
    %c0_60 = arith.constant 0 : index
    %96 = vector.load %arg14[%c0_59, %c0_60] : memref<1x128xf32, #tpu.memory_space<vmem>>, vector<1x128xf32>
    %97 = vector.broadcast %96 : vector<1x128xf32> to vector<8x128xf32>
    %98 = arith.addf %95, %97 : vector<8x128xf32>
    %cst_61 = arith.constant 0.000000e+00 : f32
    %99 = vector.broadcast %cst_61 : f32 to vector<8x128xf32>
    %100 = arith.maximumf %98, %99 : vector<8x128xf32>
    %c0_62 = arith.constant 0 : index
    %c0_63 = arith.constant 0 : index
    %101 = vector.load %arg15[%c0_62, %c0_63] : memref<128x32xf32, #tpu.memory_space<vmem>>, vector<128x32xf32>
    %cst_64 = arith.constant dense<0.000000e+00> : vector<8x32xf32>
    %102 = tpu.matmul %100, %101, %cst_64 {dimension_numbers = #tpu.dot_dimension_numbers<[1], [0], [0], [1], [0, 0, 1, 1], [], []>} : vector<8x128xf32>, vector<128x32xf32>, vector<8x32xf32> -> vector<8x32xf32>
    %c0_65 = arith.constant 0 : index
    %c0_66 = arith.constant 0 : index
    %103 = vector.load %arg16[%c0_65, %c0_66] : memref<1x32xf32, #tpu.memory_space<vmem>>, vector<1x32xf32>
    %104 = vector.broadcast %103 : vector<1x32xf32> to vector<8x32xf32>
    %105 = arith.addf %102, %104 : vector<8x32xf32>
    %106 = arith.addf %93, %105 : vector<8x32xf32>
    %cst_67 = arith.constant dense<0.000000e+00> : vector<8xf32>
    %107 = vector.multi_reduction <add>, %106, %cst_67 [1] : vector<8x32xf32> to vector<8xf32>
    %108 = vector.shape_cast %107 : vector<8xf32> to vector<8x1xf32>
    %cst_68 = arith.constant 3.200000e+01 : f32
    %109 = vector.broadcast %cst_68 : f32 to vector<8x1xf32>
    %110 = arith.divf %108, %109 : vector<8x1xf32>
    %111 = vector.broadcast %110 : vector<8x1xf32> to vector<8x32xf32>
    %112 = arith.subf %106, %111 : vector<8x32xf32>
    %113 = arith.mulf %112, %112 : vector<8x32xf32>
    %cst_69 = arith.constant dense<0.000000e+00> : vector<8xf32>
    %114 = vector.multi_reduction <add>, %113, %cst_69 [1] : vector<8x32xf32> to vector<8xf32>
    %115 = vector.shape_cast %114 : vector<8xf32> to vector<8x1xf32>
    %cst_70 = arith.constant 3.200000e+01 : f32
    %116 = vector.broadcast %cst_70 : f32 to vector<8x1xf32>
    %117 = arith.divf %115, %116 : vector<8x1xf32>
    %118 = vector.broadcast %110 : vector<8x1xf32> to vector<8x32xf32>
    %119 = arith.subf %106, %118 : vector<8x32xf32>
    %cst_71 = arith.constant 9.99999974E-6 : f32
    %120 = vector.broadcast %cst_71 : f32 to vector<8x1xf32>
    %121 = arith.addf %117, %120 : vector<8x1xf32>
    %122 = math.rsqrt %121 : vector<8x1xf32>
    %123 = vector.broadcast %122 : vector<8x1xf32> to vector<8x32xf32>
    %124 = arith.mulf %119, %123 : vector<8x32xf32>
    %c0_72 = arith.constant 0 : index
    %c0_73 = arith.constant 0 : index
    %125 = vector.load %arg17[%c0_72, %c0_73] : memref<1x32xf32, #tpu.memory_space<vmem>>, vector<1x32xf32>
    %126 = vector.broadcast %125 : vector<1x32xf32> to vector<8x32xf32>
    %127 = arith.mulf %124, %126 : vector<8x32xf32>
    %c0_74 = arith.constant 0 : index
    %c0_75 = arith.constant 0 : index
    %128 = vector.load %arg18[%c0_74, %c0_75] : memref<1x32xf32, #tpu.memory_space<vmem>>, vector<1x32xf32>
    %129 = vector.broadcast %128 : vector<1x32xf32> to vector<8x32xf32>
    %130 = arith.addf %127, %129 : vector<8x32xf32>
    %c0_76 = arith.constant 0 : index
    %c0_77 = arith.constant 0 : index
    %c0_78 = arith.constant 0 : index
    %131 = vector.load %arg19[%c0_76, %c0_77, %c0_78] : memref<1x8x32xf32, #tpu.memory_space<vmem>>, vector<1x8x32xf32>
    %132 = vector.shape_cast %131 : vector<1x8x32xf32> to vector<8x32xf32>
    %133 = vector.shape_cast %130 : vector<8x32xf32> to vector<1x8x32xf32>
    tpu.vector_store %arg19[%c0_76, %c0_77, %c0_78], %133 {strides = array<i32>} : memref<1x8x32xf32, #tpu.memory_space<vmem>>, vector<1x8x32xf32>,
    return
  }
  func.func @transform_0(%arg0: i32, %arg1: i32) -> (i32, i32, i32) {
    %c0_i32 = arith.constant 0 : i32
    %c0_i32_0 = arith.constant 0 : i32
    return %arg0, %arg1, %c0_i32 : i32, i32, i32
  }
  func.func @transform_1(%arg0: i32, %arg1: i32) -> (i32, i32, i32) {
    %c0_i32 = arith.constant 0 : i32
    %c0_i32_0 = arith.constant 0 : i32
    %c0_i32_1 = arith.constant 0 : i32
    return %arg0, %c0_i32, %c0_i32_0 : i32, i32, i32
  }
  func.func @transform_2(%arg0: i32, %arg1: i32) -> (i32, i32, i32) {
    %c0_i32 = arith.constant 0 : i32
    %c0_i32_0 = arith.constant 0 : i32
    %c0_i32_1 = arith.constant 0 : i32
    return %arg0, %c0_i32, %c0_i32_0 : i32, i32, i32
  }
  func.func @transform_3(%arg0: i32, %arg1: i32) -> (i32, i32) {
    %c0_i32 = arith.constant 0 : i32
    %c0_i32_0 = arith.constant 0 : i32
    %c0_i32_1 = arith.constant 0 : i32
    return %c0_i32, %c0_i32_0 : i32, i32
  }
  func.func @transform_4(%arg0: i32, %arg1: i32) -> (i32, i32) {
    %c0_i32 = arith.constant 0 : i32
    %c0_i32_0 = arith.constant 0 : i32
    %c0_i32_1 = arith.constant 0 : i32
    return %c0_i32, %c0_i32_0 : i32, i32
  }
  func.func @transform_5(%arg0: i32, %arg1: i32) -> (i32, i32) {
    %c0_i32 = arith.constant 0 : i32
    %c0_i32_0 = arith.constant 0 : i32
    %c0_i32_1 = arith.constant 0 : i32
    return %c0_i32, %c0_i32_0 : i32, i32
  }
  func.func @transform_6(%arg0: i32, %arg1: i32) -> (i32, i32) {
    %c0_i32 = arith.constant 0 : i32
    %c0_i32_0 = arith.constant 0 : i32
    %c0_i32_1 = arith.constant 0 : i32
    return %c0_i32, %c0_i32_0 : i32, i32
  }
  func.func @transform_7(%arg0: i32, %arg1: i32) -> (i32, i32) {
    %c0_i32 = arith.constant 0 : i32
    %c0_i32_0 = arith.constant 0 : i32
    %c0_i32_1 = arith.constant 0 : i32
    return %c0_i32, %c0_i32_0 : i32, i32
  }
  func.func @transform_8(%arg0: i32, %arg1: i32) -> (i32, i32) {
    %c0_i32 = arith.constant 0 : i32
    %c0_i32_0 = arith.constant 0 : i32
    %c0_i32_1 = arith.constant 0 : i32
    return %c0_i32, %c0_i32_0 : i32, i32
  }
  func.func @transform_9(%arg0: i32, %arg1: i32) -> (i32, i32) {
    %c0_i32 = arith.constant 0 : i32
    %c0_i32_0 = arith.constant 0 : i32
    %c0_i32_1 = arith.constant 0 : i32
    return %c0_i32, %c0_i32_0 : i32, i32
  }
  func.func @transform_10(%arg0: i32, %arg1: i32) -> (i32, i32) {
    %c0_i32 = arith.constant 0 : i32
    %c0_i32_0 = arith.constant 0 : i32
    %c0_i32_1 = arith.constant 0 : i32
    return %c0_i32, %c0_i32_0 : i32, i32
  }
  func.func @transform_11(%arg0: i32, %arg1: i32) -> (i32, i32) {
    %c0_i32 = arith.constant 0 : i32
    %c0_i32_0 = arith.constant 0 : i32
    %c0_i32_1 = arith.constant 0 : i32
    return %c0_i32, %c0_i32_0 : i32, i32
  }
  func.func @transform_12(%arg0: i32, %arg1: i32) -> (i32, i32) {
    %c0_i32 = arith.constant 0 : i32
    %c0_i32_0 = arith.constant 0 : i32
    %c0_i32_1 = arith.constant 0 : i32
    return %c0_i32, %c0_i32_0 : i32, i32
  }
  func.func @transform_13(%arg0: i32, %arg1: i32) -> (i32, i32) {
    %c0_i32 = arith.constant 0 : i32
    %c0_i32_0 = arith.constant 0 : i32
    %c0_i32_1 = arith.constant 0 : i32
    return %c0_i32, %c0_i32_0 : i32, i32
  }
  func.func @transform_14(%arg0: i32, %arg1: i32) -> (i32, i32) {
    %c0_i32 = arith.constant 0 : i32
    %c0_i32_0 = arith.constant 0 : i32
    %c0_i32_1 = arith.constant 0 : i32
    return %c0_i32, %c0_i32_0 : i32, i32
  }
  func.func @transform_15(%arg0: i32, %arg1: i32) -> (i32, i32) {
    %c0_i32 = arith.constant 0 : i32
    %c0_i32_0 = arith.constant 0 : i32
    %c0_i32_1 = arith.constant 0 : i32
    return %c0_i32, %c0_i32_0 : i32, i32
  }
  func.func @transform_16(%arg0: i32, %arg1: i32) -> (i32, i32) {
    %c0_i32 = arith.constant 0 : i32
    %c0_i32_0 = arith.constant 0 : i32
    %c0_i32_1 = arith.constant 0 : i32
    return %c0_i32, %c0_i32_0 : i32, i32
  }
  func.func @transform_17(%arg0: i32, %arg1: i32) -> (i32, i32, i32) {
    %c0_i32 = arith.constant 0 : i32
    %c0_i32_0 = arith.constant 0 : i32
    return %arg0, %arg1, %c0_i32 : i32, i32, i32
  }
}

</mosaic_0001>

<bundles_post_ra>
// kernel: tpu_custom_call.1
= control target key start
LH: loop header
LB: loop body
LE: loop exit
PB: predicated region body
PF: predicated region fallthrough
CT: control target
= control target key end

     0   :  { %s2824_s0 = inlined_call_operand.vmem [shape: f32[2,8,32], index: 0, kind: input, shape index: {}]   ;;  %s2825_s1 = inlined_call_operand.vmem [shape: f32[2,8,32], index: 1, kind: input, shape index: {}]   ;;  %s2826_s2 = inlined_call_operand.vmem [shape: f32[2,1,8], index: 2, kind: input, shape index: {}]   ;;  %s2827_s3 = inlined_call_operand.vmem [shape: f32[32,32], index: 3, kind: input, shape index: {}]   ;;  %s2828_s4 = inlined_call_operand.vmem [shape: f32[1,32], index: 4, kind: input, shape index: {}]   ;;  %s2829_s5 = inlined_call_operand.vmem [shape: f32[32,64], index: 5, kind: input, shape index: {}]   ;;  %s2830_s6 = inlined_call_operand.vmem [shape: f32[1,64], index: 6, kind: input, shape index: {}]   ;;  %s2831_s7 = inlined_call_operand.vmem [shape: f32[32,32], index: 7, kind: input, shape index: {}]   ;;  %s2832_s8 = inlined_call_operand.vmem [shape: f32[1,32], index: 8, kind: input, shape index: {}]   ;;  %s2833_s9 = inlined_call_operand.vmem [shape: f32[1,32], index: 9, kind: input, shape index: {}]   ;;  %s2834_s10 = inlined_call_operand.vmem [shape: f32[1,32], index: 10, kind: input, shape index: {}]   ;;  %s2835_s11 = inlined_call_operand.vmem [shape: f32[32,128], index: 11, kind: input, shape index: {}]   ;;  %s2836_s12 = inlined_call_operand.vmem [shape: f32[1,128], index: 12, kind: input, shape index: {}]   ;;  %s2837_s13 = inlined_call_operand.vmem [shape: f32[128,32], index: 13, kind: input, shape index: {}]   ;;  %s2838_s14 = inlined_call_operand.vmem [shape: f32[1,32], index: 14, kind: input, shape index: {}]   ;;  %s2839_s15 = inlined_call_operand.vmem [shape: f32[1,32], index: 15, kind: input, shape index: {}]   ;;  %s2840_s16 = inlined_call_operand.vmem [shape: f32[1,32], index: 16, kind: input, shape index: {}]   ;;  %s2841_s17 = inlined_call_operand.hbm [shape: f32[2,8,32], index: 17, kind: output, shape index: {}]  }
   0x1   :  { %2847 = sst [smem:[#allocation15_spill]] %s2824_s0 }
   0x2   :  { %2848 = sst [smem:[#allocation16_spill]] %s2825_s1 }
   0x3   :  { %2849 = sst [smem:[#allocation17_spill]] %s2829_s5 }
   0x4   :  { %22 = vsyncpa [#allocation7], 0 }
   0x5   :  { %24 = vsyncpa [#allocation7 + $0x1], 0  ;;  %s2472_s24 = smov 0   ;;  %s2474_s25 = smov 0  }
   0x6   :  { %s2476_s26 = smov 0   ;;  %s2478_s27 = smov 0  }
   0x7   :  { %s2480_s28 = smov 0   ;;  %s2482_s29 = smov 0  }
   0x8 LB: > { %2850 = sst [smem:[#allocation9_spill]] %s2346_s24  ;;  %s1943_s0 = sadd.s32 4294967295, %s2366_s29   ;;  %s2366_s29 = sphi %s2482_s29, %s30_s29   ;;  %s2362_s28 = sphi %s2480_s28, %s2866_s28   ;;  %s2358_s27 = sphi %s2478_s27, %s2865_s27   ;;  %s2354_s26 = sphi %s2476_s26, %s2864_s26   ;;  %s2350_s25 = sphi %s2474_s25, %s2868_s25   ;;  %s2346_s24 = sphi %s2472_s24, %s2867_s24  }
   0x9   : > { %2851 = sst [smem:[#allocation10_spill]] %s2354_s26  ;;  %s1944_s30 = sadd.s32 4294967294, %s2366_s29  }
   0xa   : > { %2852 = sst [smem:[#allocation11_spill]] %s2362_s28  ;;  %s42_s18 = sadd.s32 1, %s2362_s28 }
   0xb   : > { %s425_s19 = sadd.s32 1, %s2354_s26  ;;  %p44_p0 = scmp.ge.s32.totalorder %s42_s18, 2 }
   0xc   : > { %p435_p1 = scmp.ne.s32.totalorder %s2354_s26, %s2350_s25  ;;  %p436_p2 = scmp.eq.s32.totalorder %s1943_s0, 1 }
   0xd   : > { %p441_p3 = scmp.ne.s32.totalorder %s2350_s25, %s2346_s24  ;;  %s2870_s18 = smov (%p44_p0, %s42_s18), 0 }
   0xe   : > { %2853 = sst [smem:[#allocation12_spill]] %s2870_s18  ;;  %p2512_p4 = por %p436_p2, %p435_p1 }
   0xf   : > { %p442_p5 = scmp.eq.s32.totalorder %s1944_s30, 1  ;;  %s420_s20 = ssub.s32 %s2362_s28, %s2870_s18 }
  0x10   : > { %p1947_p6 = scmp.ge.s32.totalorder %s2366_s29, 1  ;;  %p423_p7 = scmp.eq.s32.totalorder %s420_s20, 0 }
  0x11   : > { %p2519_p8 = por %p442_p5, %p441_p3  ;;  %p525_p9 = scmp.lt.s32.totalorder %s2366_s29, 3 }
  0x12   : > { %s2525_s22 = scalar_select %p423_p7, %s2354_s26, %s425_s19  }
  0x13   : > { %s2855_s21 = scalar_select %p2519_p8, 1, 0 }
  0x14   : > { %2857 = sst [smem:[#allocation14_spill]] %s2525_s22  ;;  %p526_p10 = pnand %p1947_p6, %p525_p9 }
  0x15   : > { %2856 = sst [smem:[#allocation13_spill]] %s2855_s21  ;;  %s2858_s5 = sld [smem:[#allocation17_spill]] (!%p526_p10)  ;;  %v2368_v3 = vmov (!%p526_p10), 0.0|0.0   ;;  %vm2369_vm0 = vmmov (!%p526_p10), 0   ;;  %v2370_v6 = vmov (!%p526_p10), 0.0   ;;  %v728_v8 = vld [vmem:[%s2827_s3] sm:$0xff] (!%p526_p10)  ;;  %v843_v38 = vlaneseq (!%p526_p10) }
  0x16   : > { %529 = sbr.rel (%p526_p10) target bundleno = 2542 (0x9ee), region = 88  ;;  %2152 = vmatprep.subr.bf16.mxu1 (!%p526_p10), %v2368_v3  ;;  %2041 = vmatprep.mubr.msk.f32.mxu1 (!%p526_p10), %vm2369_vm0, %v2370_v6  ;;  %p586_p11 = scmp.lt.s32.totalorder (!%p526_p10), %s2358_s27, 1  ;;  %v729_v9 = vld [vmem:[%s2827_s3 + $0x8] sm:$0xff] (!%p526_p10)  ;;  %vm617_vm1 = vcmask (!%p526_p10), 261120   ;;  %v730_v12 = vld [vmem:[%s2827_s3 + $0x10] sm:$0xff] (!%p526_p10)  ;;  %v731_v13 = vld [vmem:[%s2827_s3 + $0x18] sm:$0xff] (!%p526_p10) }
  0x17   : > { %2055 = vmatprep.subr.mxu0 (!%p526_p10), %v2370_v6  ;;  %2057 = vmatprep.mubr.msk.f32.mxu0 (!%p526_p10), %vm2369_vm0, %v2370_v6  ;;  %v2159_v11 = vpack.c.bf16 (!%p526_p10), %v729_v9, %v728_v8  ;;  %v2162_v14 = vpack.c.bf16 (!%p526_p10), %v731_v13, %v730_v12  ;;  %s2860_s23 = sld [smem:[#allocation15_spill]] (!%p526_p10)  ;;  %v1951_v16 = vld [vmem:[%s2830_s6] ss:$0 sm:$0xff] (!%p526_p10)  ;;  %vm691_vm2 = vcmask (!%p526_p10), 64512   ;;  %s2372_s20 = smov (!%p526_p10), 120   ;;  %v844_v40 = vshrl.u32 (!%p526_p10), %v843_v38, 7 }
  0x18   : > { %v1953_v20 = vld [vmem:[%s2828_s4] ss:$0 sm:$0xff] (!%p526_p10)  ;;  %s2373_s18 = smov (!%p526_p10), 112   ;;  %s2376_s26 = smov (!%p526_p10), 72   ;;  %vm1497_vm4 = vcmask (!%p526_p10), 130112   ;;  %vm1503_vm5 = vcmask (!%p526_p10), 195712  }
  0x19   : > { %v845_v41 = vsub.s32 (!%p526_p10), 0, %v844_v40  ;;  %s2377_s21 = smov (!%p526_p10), 88   ;;  %vm1509_vm6 = vcmask (!%p526_p10), 261312  }
  0x1b   : > { %v606_v0 = vld [vmem:[%s2858_s5] sm:$0xff] (!%p526_p10)  ;;  %v607_v1 = vld [vmem:[%s2858_s5 + $0x8] sm:$0xff] (!%p526_p10)  ;;  %v608_v2 = vld [vmem:[%s2858_s5 + $0x10] sm:$0xff] (!%p526_p10) }
  0x1c   : > { %v2153_v4 = vpack.c.bf16 (!%p526_p10), %v607_v1, %v606_v0  ;;  %v609_v5 = vld [vmem:[%s2858_s5 + $0x18] sm:$0xff] (!%p526_p10)  ;;  %s2859_s5 = sld [smem:[#allocation16_spill]] (!%p526_p10) }
  0x1d   : > { %v2156_v7 = vpack.c.bf16 %v609_v5, %v608_v2  ;;  %s2547_s24 = scalar_select %p586_p11, %s2358_s27, 1 }
  0x1e   : > { %2154 = vmatpush3.bf16.msra.mxu1 %v2153_v4 }
  0x1f   : > { %2155 = vmatprep.subr.bf16.mxu1 %v2368_v3  ;;  %s1949_s30 = sshll.u32 %s2547_s24, 3 }
  0x20   : > { %s592_s0 = scalar_lea.vmem %s2860_s23, %s1949_s30  ;;  %s599_s23 = scalar_lea.vmem %s2826_s2, %s2547_s24 }
  0x21   : > { %v2574_v15 = vld [vmem:[%s592_s0] sm:$0xff]  ;;  %s2374_s24 = smov 96   ;;  %s2375_s0 = smov 80  }
  0x22   : > { %s596_s22 = scalar_lea.vmem %s2859_s5, %s1949_s30  ;;  %2157 = vmatpush3.bf16.msra.mxu1 %v2156_v7  ;;  %s2371_s30 = smov 104   ;;  %v839_v39 = vld [vmem:[%s599_s23] sm:$0x1] }
  0x23   : > { %v605_v10 = vld [vmem:[%s596_s22] sm:$0xff]  ;;  %2158 = vmatprep.subr.bf16.mxu1 %v2368_v3  ;;  %vm840_vm3 = vcmp.eq.f32.partialorder %v839_v39, 0.0  ;;  %s1977_s23 = sshll.u32 %s2358_s27, 7  ;;  %s2381_s27 = smov [#allocation6]  }
  0x24   : > { %v841_v42 = vsel %vm840_vm3, -1e+30, %v2370_v6 }
  0x25   : > { %2042 = vmatmul.mubr.msk.f32.vlgmr.msra.gmra.mrb[0].mxu1 %vm617_vm1, %v605_v10  ;;  %v846_v43 = vrot.slane %v841_v42, %v845_v41  ;;  %v1512_v41 = vld [vmem:[%s2831_s7] sm:$0xff]  ;;  %v1513_v42 = vld [vmem:[%s2831_s7 + $0x8] sm:$0xff] }
  0x26   : > { %2160 = vmatpush3.bf16.msra.mxu1 %v2159_v11  ;;  %2052 = vmatprep.mubr.msk.f32.mxu1 %vm2369_vm0, %v2370_v6 }
  0x27   : > { %2161 = vmatprep.subr.bf16.mxu1 %v2368_v3 }
  0x2a   : > { %2163 = vmatpush3.bf16.msra.mxu1 %v2162_v14 }
  0x2b   : > { %2060 = vmatprep.subr.mxu1 %v2370_v6 }
  0x2d   : > { %2053 = vmatmul.mubr.msk.f32.vlgmr.msra.gmra.mrb[2].mxu1 %vm617_vm1, %v2574_v15 }
  0x2e   : > { %2062 = vmatprep.mubr.msk.f32.mxu1 %vm2369_vm0, %v2370_v6 }
  0xf8   : > { %v687_v17 = vpop.f32.mrb[0].mxu1 }
  0xf9   : > { %v2584_v18 = vadd.f32 %v1951_v16, %v687_v17  ;;  %v2043_v19 = vpop.f32.mrb[1].mxu1 }
  0xfb   : > { %692 = vst.msk [vmem:[#allocation3] sm:$0xff] %vm691_vm2, %v2584_v18  ;;  %718 = vrot.lane.b32.xlu1 %v2584_v18, %s2371_s30  ;;  %698 = vrot.lane.b32.xlu0 %v2584_v18, %s2372_s20 }
  0xff   : > { %708 = vrot.lane.b32.xlu0 %v2584_v18, %s2373_s18 }
 0x100   : > { %v809_v21 = vpop.f32.mrb[2].mxu1 }
 0x101   : > { %v810_v22 = vadd.f32 %v1953_v20, %v809_v21  ;;  %v2054_v23 = vpop.f32.mrb[3].mxu1 }
 0x102   : > { %v835_v24 = vld [vmem:[#allocation3] sm:$0xff] }
 0x103   : > { %814 = vst.msk [vmem:[#allocation2] sm:$0xff] %vm691_vm2, %v810_v22  ;;  %2056 = vmatpush3.xpose.msk.msra.mxu0 %vm691_vm2, %v835_v24  ;;  %821 = vrot.lane.b32.xlu0 %v810_v22, %s2373_s18 }
 0x104   : > { %816 = vrot.lane.b32.xlu1 %v810_v22, %s2372_s20  ;;  %2065 = vmatprep.subr.mxu0 %v2370_v6  ;;  %s583_s20 = sand.u32 1, %s2350_s25  }
 0x105   : > { %s1948_s19 = sshll.u32 %s583_s20, 3  ;;  %s1837_s28 = scalar_lea.sflag [#allocation7], %s583_s20 }
 0x108   : > { %826 = vrot.lane.b32.xlu1 %v810_v22, %s2371_s30  ;;  %s2776_s30 = scalar_lea.hbm %s2841_s17, %s1977_s23 }
 0x10a   : > { %v831_v25 = vld [vmem:[#allocation2] sm:$0xff] }
 0x10b   : > { %2058 = vmatmul.mubr.msk.f32.vlgmr.msra.gmra.mrb[0].mxu0 %vm691_vm2, %v831_v25 }
 0x10c   : > { %2067 = vmatprep.mubr.msk.f32.mxu0 %vm2369_vm0, %v2370_v6 }
 0x16d   : > { %v719_v26 = vpop.permute.xlu1 %718  ;;  %v699_v27 = vpop.permute.xlu0 %698 }
 0x16e   : > { %722 = vst.msk [vmem:[#allocation3 + $0x18] sm:$0xff] %vm691_vm2, %v719_v26  ;;  %702 = vst.msk [vmem:[#allocation3 + $0x8] sm:$0xff] %vm691_vm2, %v699_v27 }
 0x171   : > { %v709_v28 = vpop.permute.xlu0 %708 }
 0x172   : > { %712 = vst.msk [vmem:[#allocation3 + $0x10] sm:$0xff] %vm691_vm2, %v709_v28 }
 0x175   : > { %v822_v29 = vpop.permute.xlu0 %821  ;;  %v836_v30 = vld [vmem:[#allocation3 + $0x8] sm:$0xff]  ;;  %v838_v36 = vld [vmem:[#allocation3 + $0x18] sm:$0xff] }
 0x176   : > { %825 = vst.msk [vmem:[#allocation2 + $0x10] sm:$0xff] %vm691_vm2, %v822_v29  ;;  %v817_v31 = vpop.permute.xlu1 %816  ;;  %2061 = vmatpush3.xpose.msk.msra.mxu1 %vm691_vm2, %v836_v30 }
 0x177   : > { %820 = vst.msk [vmem:[#allocation2 + $0x8] sm:$0xff] %vm691_vm2, %v817_v31  ;;  %2070 = vmatprep.subr.mxu1 %v2370_v6 }
 0x179   : > { %v837_v32 = vld [vmem:[#allocation3 + $0x10] sm:$0xff] }
 0x17a   : > { %v827_v33 = vpop.permute.xlu1 %826  ;;  %2066 = vmatpush3.xpose.msk.msra.mxu0 %vm691_vm2, %v837_v32 }
 0x17b   : > { %830 = vst.msk [vmem:[#allocation2 + $0x18] sm:$0xff] %vm691_vm2, %v827_v33  ;;  %2075 = vmatprep.subr.mxu0 %v2370_v6 }
 0x17d   : > { %v833_v34 = vld [vmem:[#allocation2 + $0x10] sm:$0xff] }
 0x17e   : > { %v832_v35 = vld [vmem:[#allocation2 + $0x8] sm:$0xff]  ;;  %2068 = vmatmul.mubr.msk.f32.vlgmr.msra.gmra.mrb[2].mxu0 %vm691_vm2, %v833_v34 }
 0x17f   : > { %2063 = vmatmul.mubr.msk.f32.vlgmr.msra.gmra.mrb[4].mxu1 %vm691_vm2, %v832_v35  ;;  %2077 = vmatprep.mubr.msk.f32.mxu0 %vm2369_vm0, %v2370_v6 }
 0x180   : > { %2071 = vmatpush3.xpose.msk.msra.mxu1 %vm691_vm2, %v838_v36  ;;  %2072 = vmatprep.mubr.msk.f32.mxu1 %vm2369_vm0, %v2370_v6 }
 0x181   : > { %2080 = vmatprep.subr.mxu1 %v2370_v6 }
 0x182   : > { %v834_v37 = vld [vmem:[#allocation2 + $0x18] sm:$0xff] }
 0x183   : > { %2073 = vmatmul.mubr.msk.f32.vlgmr.msra.gmra.mrb[6].mxu1 %vm691_vm2, %v834_v37 }
 0x184   : > { %2082 = vmatprep.mubr.msk.f32.mxu1 %vm2369_vm0, %v2370_v6 }
 0x1de   : > { %v920_v44 = vpop.f32.mrb[0].mxu0 }
 0x1df   : > { %v921_v45 = vadd.f32 %v920_v44, %v846_v43  ;;  %v2059_v46 = vpop.f32.mrb[1].mxu0  ;;  %v1514_v44 = vld [vmem:[%s2831_s7 + $0x10] sm:$0xff] }
 0x1e1   : > { %v1152_v47 = vsel %vm691_vm2, %v921_v45, -inf }
 0x1e2   : > { %1153 = vmax.xlane.f32.xlu0 %v1152_v47 }
 0x251   : > { %v1072_v48 = vpop.f32.mrb[2].mxu0 }
 0x252   : > { %v996_v49 = vpop.f32.mrb[4].mxu1  ;;  %v1073_v50 = vadd.f32 %v1072_v48, %v846_v43  ;;  %v2069_v51 = vpop.f32.mrb[3].mxu0 }
 0x253   : > { %v997_v52 = vadd.f32 %v996_v49, %v846_v43  ;;  %v2064_v53 = vpop.f32.mrb[5].mxu1 }
 0x254   : > { %v1158_v54 = vsel %vm691_vm2, %v1073_v50, -inf }
 0x255   : > { %1159 = vmax.xlane.f32.xlu0 %v1158_v54  ;;  %v1155_v55 = vsel %vm691_vm2, %v997_v52, -inf }
 0x256   : > { %1156 = vmax.xlane.f32.xlu1 %v1155_v55  ;;  %v1148_v56 = vpop.f32.mrb[6].mxu1 }
 0x257   : > { %v1149_v57 = vadd.f32 %v1148_v56, %v846_v43  ;;  %v2074_v58 = vpop.f32.mrb[7].mxu1  ;;  %v2165_v43 = vpack.c.bf16 %v1513_v42, %v1512_v41  ;;  %v1727_v41 = vld [vmem:[%s2837_s13 + $0x78] sm:$0xff] }
 0x259   : > { %v1161_v59 = vsel %vm691_vm2, %v1149_v57, -inf }
 0x25a   : > { %1162 = vmax.xlane.f32.xlu0 %v1161_v59 }
 0x267   : > { %694 = vrot.lane.b32.xlu1 %v2584_v18, %s2374_s24  ;;  %s2378_s24 = smov 16  }
 0x26f   : > { %v1154_v60 = vpop.xlane.xlu0 %1153 }
 0x270   : > { %v1164_v61 = vsub.f32 %v921_v45, %v1154_v60  ;;  %v1515_v45 = vld [vmem:[%s2831_s7 + $0x18] sm:$0xff] }
 0x271   : > { %v2168_v46 = vpack.c.bf16 %v1515_v45, %v1514_v44 }
 0x272   : > { %v1168_v62 = vmul.f32 1.442695, %v1164_v61 }
 0x274   : > { %2268 = vpow2.f32 %v1168_v62 }
 0x27e   : > { %v2269_v63 = vpop.eup %2268 }
 0x27f   : > { %v1176_v0 = vsel %vm691_vm2, %v2269_v63, 0.0 }
 0x28b   : > { %1177 = vadd.xlane.f32.xlu1 %v1176_v0 }
 0x2e2   : > { %v1160_v1 = vpop.xlane.xlu0 %1159 }
 0x2e3   : > { %v1166_v2 = vsub.f32 %v1073_v50, %v1160_v1  ;;  %v1157_v4 = vpop.xlane.xlu1 %1156 }
 0x2e4   : > { %v1165_v5 = vsub.f32 %v997_v52, %v1157_v4 }
 0x2e5   : > { %v1172_v7 = vmul.f32 1.442695, %v1166_v2 }
 0x2e6   : > { %v1170_v8 = vmul.f32 1.442695, %v1165_v5  ;;  %v1628_v5 = vld [vmem:[%s2835_s11 + $0x8] sm:$0xff] }
 0x2e7   : > { %2270 = vpow2.f32 %v1172_v7  ;;  %v695_v9 = vpop.permute.xlu1 %694  ;;  %v1163_v10 = vpop.xlane.xlu0 %1162 }
 0x2e8   : > { %2272 = vpow2.f32 %v1170_v8  ;;  %697 = vst.msk [vmem:[#allocation4] sm:$0xff] %vm691_vm2, %v695_v9  ;;  %v1167_v11 = vsub.f32 %v1149_v57, %v1163_v10  ;;  %v1967_v57 = vld [vmem:[%s2832_s8] ss:$0 sm:$0xff]  ;;  %v1630_v8 = vld [vmem:[%s2835_s11 + $0x18] sm:$0xff] }
 0x2e9   : > { %v1712_v10 = vld [vmem:[%s2837_s13] sm:$0xff] }
 0x2ea   : > { %v1174_v12 = vmul.f32 1.442695, %v1167_v11  ;;  %v1713_v11 = vld [vmem:[%s2837_s13 + $0x8] sm:$0xff] }
 0x2ec   : > { %2274 = vpow2.f32 %v1174_v12  ;;  %v1714_v12 = vld [vmem:[%s2837_s13 + $0x10] sm:$0xff] }
 0x2ef   : > { %v1196_v13 = vld [vmem:[#allocation4] sm:$0xff] }
 0x2f0   : > { %2076 = vmatpush3.msra.mxu0 %v1196_v13  ;;  %v2177_v13 = vpack.c.bf16 %v1713_v11, %v1712_v10 }
 0x2f1   : > { %v2271_v14 = vpop.eup %2270  ;;  %2085 = vmatprep.subr.mxu0 %v2370_v6 }
 0x2f2   : > { %v2273_v16 = vpop.eup %2272  ;;  %v1182_v17 = vsel %vm691_vm2, %v2271_v14, 0.0 }
 0x2f3   : > { %1183 = vadd.xlane.f32.xlu1 %v1182_v17  ;;  %v1179_v19 = vsel %vm691_vm2, %v2273_v16, 0.0  ;;  %v1716_v17 = vld [vmem:[%s2837_s13 + $0x20] sm:$0xff] }
 0x2f4   : > { %1180 = vadd.xlane.f32.xlu0 %v1179_v19  ;;  %v1717_v19 = vld [vmem:[%s2837_s13 + $0x28] sm:$0xff] }
 0x2f6   : > { %v2275_v20 = vpop.eup %2274 }
 0x2f7   : > { %v1185_v21 = vsel %vm691_vm2, %v2275_v20, 0.0 }
 0x2f8   : > { %1186 = vadd.xlane.f32.xlu0 %v1185_v21  ;;  %v1718_v21 = vld [vmem:[%s2837_s13 + $0x30] sm:$0xff] }
 0x304   : > { %713 = vrot.lane.b32.xlu1 %v2584_v18, %s2375_s0  ;;  %s2379_s0 = smov 8  }
 0x308   : > { %723 = vrot.lane.b32.xlu1 %v2584_v18, %s2376_s26  ;;  %s2380_s26 = smov 24  }
 0x30e   : > { %703 = vrot.lane.b32.xlu0 %v2584_v18, %s2377_s21 }
 0x318   : > { %v1178_v22 = vpop.xlane.xlu1 %1177 }
 0x319   : > { %2276 = vrcp.f32 %v1178_v22  ;;  %v1719_v22 = vld [vmem:[%s2837_s13 + $0x38] sm:$0xff] }
 0x323   : > { %v2277_v23 = vpop.eup %2276 }
 0x324   : > { %v1192_v24 = vmul.f32 %v2277_v23, %v2269_v63  ;;  %v2186_v23 = vpack.c.bf16 %v1719_v22, %v1718_v21 }
 0x326   : > { %2078 = vmatmul.mubr.msk.f32.vlgmr.msra.gmra.mrb[4].mxu0 %vm691_vm2, %v1192_v24  ;;  %v1720_v24 = vld [vmem:[%s2837_s13 + $0x40] sm:$0xff] }
 0x327   : > { %2087 = vmatprep.mubr.msk.f32.mxu0 %vm2369_vm0, %v2370_v6 }
 0x380   : > { %v1184_v25 = vpop.xlane.xlu1 %1183 }
 0x381   : > { %2278 = vrcp.f32 %v1184_v25  ;;  %v1181_v26 = vpop.xlane.xlu0 %1180  ;;  %v1721_v25 = vld [vmem:[%s2837_s13 + $0x48] sm:$0xff] }
 0x382   : > { %2280 = vrcp.f32 %v1181_v26  ;;  %v2189_v26 = vpack.c.bf16 %v1721_v25, %v1720_v24 }
 0x384   : > { %v714_v27 = vpop.permute.xlu1 %713 }
 0x385   : > { %717 = vst.msk [vmem:[#allocation4 + $0x10] sm:$0xff] %vm691_vm2, %v714_v27  ;;  %v1187_v28 = vpop.xlane.xlu0 %1186  ;;  %v1722_v27 = vld [vmem:[%s2837_s13 + $0x50] sm:$0xff] }
 0x386   : > { %2282 = vrcp.f32 %v1187_v28  ;;  %v1723_v28 = vld [vmem:[%s2837_s13 + $0x58] sm:$0xff] }
 0x388   : > { %v724_v29 = vpop.permute.xlu1 %723 }
 0x389   : > { %727 = vst.msk [vmem:[#allocation4 + $0x18] sm:$0xff] %vm691_vm2, %v724_v29  ;;  %v704_v18 = vpop.permute.xlu0 %703  ;;  %v2192_v29 = vpack.c.bf16 %v1723_v28, %v1722_v27 }
 0x38a   : > { %707 = vst.msk [vmem:[#allocation4 + $0x8] sm:$0xff] %vm691_vm2, %v704_v18  ;;  %v1724_v18 = vld [vmem:[%s2837_s13 + $0x60] sm:$0xff] }
 0x38b   : > { %v2279_v30 = vpop.eup %2278 }
 0x38c   : > { %v1194_v31 = vmul.f32 %v2279_v30, %v2271_v14  ;;  %v1198_v32 = vld [vmem:[#allocation4 + $0x10] sm:$0xff]  ;;  %v2281_v33 = vpop.eup %2280  ;;  %v1715_v14 = vld [vmem:[%s2837_s13 + $0x18] sm:$0xff]  ;;  %v1725_v30 = vld [vmem:[%s2837_s13 + $0x68] sm:$0xff] }
 0x38d   : > { %2086 = vmatpush3.msra.mxu0 %v1198_v32  ;;  %v1193_v34 = vmul.f32 %v2281_v33, %v2273_v16  ;;  %v2180_v16 = vpack.c.bf16 %v1715_v14, %v1714_v12 }
 0x38e   : > { %2088 = vmatmul.mubr.msk.f32.vlgmr.msra.gmra.mrb[6].mxu0 %vm691_vm2, %v1194_v31  ;;  %2176 = vmatprep.subr.bf16.mxu0 %v2368_v3  ;;  %v2195_v31 = vpack.c.bf16 %v1725_v30, %v1724_v18 }
 0x38f   : > { %2149 = vmatprep.mubr.msk.f32.mxu0 %vm2369_vm0, %v2370_v6  ;;  %2178 = vmatpush3.bf16.msra.mxu0 %v2177_v13 }
 0x390   : > { %v2283_v36 = vpop.eup %2282  ;;  %v1199_v37 = vld [vmem:[#allocation4 + $0x18] sm:$0xff]  ;;  %2179 = vmatprep.subr.bf16.mxu0 %v2368_v3 }
 0x391   : > { %v1197_v35 = vld [vmem:[#allocation4 + $0x8] sm:$0xff]  ;;  %v1195_v38 = vmul.f32 %v2283_v36, %v2275_v20  ;;  %v2183_v20 = vpack.c.bf16 %v1717_v19, %v1716_v17  ;;  %v1969_v36 = vld [vmem:[%s2833_s9] ss:$0 sm:$0xff] }
 0x392   : > { %2081 = vmatpush3.msra.mxu1 %v1197_v35 }
 0x393   : > { %2083 = vmatmul.mubr.msk.f32.vlgmr.msra.gmra.mrb[8].mxu1 %vm691_vm2, %v1193_v34  ;;  %2090 = vmatprep.subr.mxu1 %v2370_v6 }
 0x394   : > { %2091 = vmatpush3.msra.mxu1 %v1199_v37  ;;  %2092 = vmatprep.mubr.msk.f32.mxu1 %vm2369_vm0, %v2370_v6 }
 0x395   : > { %2164 = vmatprep.subr.bf16.mxu1 %v2368_v3  ;;  %2181 = vmatpush3.bf16.msra.mxu0 %v2180_v16 }
 0x396   : > { %2182 = vmatprep.subr.bf16.mxu0 %v2368_v3 }
 0x397   : > { %2093 = vmatmul.mubr.msk.f32.vlgmr.msra.gmra.mrb[10].mxu1 %vm691_vm2, %v1195_v38  ;;  %v1970_v38 = vld [vmem:[%s2834_s10] ss:$0 sm:$0xff] }
 0x398   : > { %2103 = vmatprep.mubr.msk.f32.mxu1 %vm2369_vm0, %v2370_v6  ;;  %2166 = vmatpush3.bf16.msra.mxu1 %v2165_v43  ;;  %v1971_v43 = vld [vmem:[%s2836_s12] ss:$0 sm:$0xff] }
 0x399   : > { %2167 = vmatprep.subr.bf16.mxu1 %v2368_v3  ;;  %2184 = vmatpush3.bf16.msra.mxu0 %v2183_v20 }
 0x39a   : > { %2185 = vmatprep.subr.bf16.mxu0 %v2368_v3 }
 0x39c   : > { %2169 = vmatpush3.bf16.msra.mxu1 %v2168_v46 }
 0x39d   : > { %2170 = vmatprep.subr.bf16.mxu1 %v2368_v3  ;;  %2187 = vmatpush3.bf16.msra.mxu0 %v2186_v23 }
 0x39e   : > { %2188 = vmatprep.subr.bf16.mxu0 %v2368_v3 }
 0x3a1   : > { %2190 = vmatpush3.bf16.msra.mxu0 %v2189_v26 }
 0x3a2   : > { %2191 = vmatprep.subr.bf16.mxu0 %v2368_v3 }
 0x3a5   : > { %2193 = vmatpush3.bf16.msra.mxu0 %v2192_v29 }
 0x3a6   : > { %2194 = vmatprep.subr.bf16.mxu0 %v2368_v3 }
 0x3a9   : > { %2196 = vmatpush3.bf16.msra.mxu0 %v2195_v31 }
 0x3aa   : > { %2197 = vmatprep.subr.bf16.mxu0 %v2368_v3 }
 0x3f9   : > { %v1269_v39 = vpop.f32.mrb[4].mxu0 }
 0x3fa   : > { %1492 = vst.msk [vmem:[#allocation5] sm:$0xff] %vm691_vm2, %v1269_v39  ;;  %v2079_v40 = vpop.f32.mrb[5].mxu0 }
 0x461   : > { %v1415_v47 = vpop.f32.mrb[6].mxu0 }
 0x462   : > { %1500 = vrot.lane.b32.xlu1 %v1415_v47, %s2378_s24  ;;  %v2089_v48 = vpop.f32.mrb[7].mxu0  ;;  %s585_s24 = scalar_lea.vmem [#allocation6], %s1948_s19  ;;  %s2292_s19 = sshll.u32 %s2381_s27, 4  ;;  %s2293_s19 = int_to_ptr.vmem [resolvable:$false] %s2292_s19 }
 0x463   : > { %v1973_v48 = vld [vmem:[%s2838_s14] ss:$0 sm:$0xff]  ;;  %s2294_s5 = scalar_lea.vmem %s2293_s19, 256 }
 0x466   : > { %v1342_v49 = vpop.f32.mrb[8].mxu1 }
 0x467   : > { %1494 = vrot.lane.b32.xlu0 %v1342_v49, %s2379_s0  ;;  %v2084_v50 = vpop.f32.mrb[9].mxu1  ;;  %s1851_s0 = sshll.u32 %s585_s24, 4  ;;  %s2778_s0 = int_to_ptr.vmem [resolvable:$true] %s1851_s0 }
 0x468   : > { %s2288_s18 = scalar_lea.vmem %s2778_s0, 128  ;;  %p2295_p1 = scmp.lt.s32.totalorder %s2778_s0, %s2293_s19 }
 0x469   : > { %p2289_p12 = scmp.ne.s32.totalorder %s2778_s0, %s2288_s18  ;;  %p2296_p2 = scmp.lt.s32.totalorder %s2294_s5, %s2288_s18 }
 0x46a   : > { %v1488_v51 = vpop.f32.mrb[10].mxu1 }
 0x46b   : > { %1506 = vrot.lane.b32.xlu0 %v1488_v51, %s2380_s26  ;;  %v2094_v52 = vpop.f32.mrb[11].mxu1  ;;  %p2290_p13 = pnand %p2289_p12, %p2512_p4  ;;  %p2297_p3 = por %p2296_p2, %p2295_p1 }
 0x46d   : > { %p2291_p0 = pneg %p2290_p13 }
 0x46f   : > { %p2298_p5 = pnand %p2297_p3, %p2291_p0 }
 0x4d4   : > { %v1501_v54 = vpop.permute.xlu1 %1500 }
 0x4d9   : > { %v1495_v53 = vpop.permute.xlu0 %1494 }
 0x4da   : > { %1498 = vst.msk [vmem:[#allocation5] sm:$0xff] %vm1497_vm4, %v1495_v53 }
 0x4db   : > { %1504 = vst.msk [vmem:[#allocation5] sm:$0xff] %vm1503_vm5, %v1501_v54 }
 0x4dd   : > { %v1507_v55 = vpop.permute.xlu0 %1506 }
 0x4de   : > { %1510 = vst.msk [vmem:[#allocation5] sm:$0xff] %vm1509_vm6, %v1507_v55 }
 0x4e5   : > { %v1511_v56 = vld [vmem:[#allocation5] sm:$0xff] }
 0x4e6   : > { %2104 = vmatmul.mubr.msk.f32.vlgmr.msra.gmra.mrb[12].mxu1 %vm617_vm1, %v1511_v56 }
 0x4e7   : > { %2114 = vmatprep.mubr.msk.f32.mxu1 %vm2369_vm0, %v2370_v6  ;;  %v1627_v6 = vld [vmem:[%s2835_s11] sm:$0xff] }
 0x4e8   : > { %v2171_v7 = vpack.c.bf16 %v1628_v5, %v1627_v6 }
 0x4ea   : > { %2172 = vmatpush3.bf16.msra.mxu1 %v2171_v7 }
 0x4eb   : > { %2173 = vmatprep.subr.bf16.mxu1 %v2368_v3  ;;  %v1726_v3 = vld [vmem:[%s2837_s13 + $0x70] sm:$0xff] }
 0x4ec   : > { %v2198_v42 = vpack.c.bf16 %v1727_v41, %v1726_v3 }
 0x4ee   : > { %2199 = vmatpush3.bf16.msra.mxu0 %v2198_v42 }
 0x5b9   : > { %v1592_v58 = vpop.f32.mrb[12].mxu1 }
 0x5ba   : > { %v1593_v59 = vadd.f32 %v1967_v57, %v1592_v58  ;;  %v2105_v60 = vpop.f32.mrb[13].mxu1 }
 0x5bc   : > { %v1596_v61 = vadd.f32 %v1593_v59, %v2574_v15  ;;  %v1629_v15 = vld [vmem:[%s2835_s11 + $0x10] sm:$0xff] }
 0x5bd   : > { %v2174_v9 = vpack.c.bf16 %v1630_v8, %v1629_v15 }
 0x5be   : > { %v1597_v62 = vsel %vm617_vm1, %v1596_v61, 0.0 }
 0x5bf   : > { %1598 = vadd.xlane.f32.xlu1 %v1597_v62  ;;  %2175 = vmatpush3.bf16.msra.mxu1 %v2174_v9 }
 0x64c   : > { %v1599_v63 = vpop.xlane.xlu1 %1598 }
 0x64d   : > { %v1601_v0 = vmul.f32 0.03125, %v1599_v63  ;;  %v1974_v63 = vld [vmem:[%s2839_s15] ss:$0 sm:$0xff] }
 0x64f   : > { %v1602_v1 = vsub.f32 %v1596_v61, %v1601_v0 }
 0x651   : > { %v1603_v2 = vmul.f32 %v1602_v1, %v1602_v1 }
 0x653   : > { %v1604_v4 = vsel %vm617_vm1, %v1603_v2, 0.0 }
 0x654   : > { %1605 = vadd.xlane.f32.xlu0 %v1604_v4 }
 0x6e1   : > { %v1606_v32 = vpop.xlane.xlu0 %1605 }
 0x6e2   : > { %v1607_v33 = vmul.f32 0.03125, %v1606_v32 }
 0x6e4   : > { %v1608_v34 = vadd.f32 1e-05, %v1607_v33 }
 0x6e6   : > { %2284 = vrsqrt.f32 %v1608_v34 }
 0x6f0   : > { %v2285_v35 = vpop.eup %2284 }
 0x6f1   : > { %v1610_v37 = vmul.f32 %v2285_v35, %v1602_v1  ;;  %v1975_v1 = vld [vmem:[%s2840_s16] ss:$0 sm:$0xff] }
 0x6f3   : > { %v1618_v39 = vmul.f32 %v1969_v36, %v1610_v37 }
 0x6f5   : > { %v1626_v40 = vadd.f32 %v1970_v38, %v1618_v39 }
 0x6f7   : > { %2115 = vmatmul.mubr.msk.f32.vlgmr.msra.gmra.mrb[14].mxu1 %vm617_vm1, %v1626_v40 }
 0x7ca   : > { %v1707_v44 = vpop.f32.mrb[14].mxu1 }
 0x7cb   : > { %v1708_v45 = vadd.f32 %v1971_v43, %v1707_v44  ;;  %v2116_v46 = vpop.f32.mrb[15].mxu1 }
 0x7cd   : > { %v1711_v47 = vmax.f32 %v1708_v45, 0.0 }
 0x7cf   : > { %2150 = vmatmul.mubr.f32.vlgmr.msra.gmra.mrb[8].mxu0 %v1711_v47 }
 0x8a2   : > { %v1801_v49 = vpop.f32.mrb[8].mxu0 }
 0x8a3   : > { %v1802_v50 = vadd.f32 %v1973_v48, %v1801_v49  ;;  %v2151_v51 = vpop.f32.mrb[9].mxu0 }
 0x8a5   : > { %v1805_v52 = vadd.f32 %v1802_v50, %v1626_v40 }
 0x8a7   : > { %v1806_v53 = vsel %vm617_vm1, %v1805_v52, 0.0 }
 0x8a8   : > { %1807 = vadd.xlane.f32.xlu0 %v1806_v53 }
 0x935   : > { %v1808_v54 = vpop.xlane.xlu0 %1807 }
 0x936   : > { %v1809_v55 = vmul.f32 0.03125, %v1808_v54 }
 0x938   : > { %v1810_v56 = vsub.f32 %v1805_v52, %v1809_v55 }
 0x93a   : > { %v1811_v57 = vmul.f32 %v1810_v56, %v1810_v56 }
 0x93c   : > { %v1812_v58 = vsel %vm617_vm1, %v1811_v57, 0.0 }
 0x93d   : > { %1813 = vadd.xlane.f32.xlu1 %v1812_v58 }
 0x9ca   : > { %v1814_v59 = vpop.xlane.xlu1 %1813 }
 0x9cb   : > { %v1815_v60 = vmul.f32 0.03125, %v1814_v59 }
 0x9cd   : > { %v1816_v61 = vadd.f32 1e-05, %v1815_v60 }
 0x9cf   : > { %2286 = vrsqrt.f32 %v1816_v61 }
 0x9d9   : > { %v2287_v62 = vpop.eup %2286 }
 0x9da   : > { %v1818_v0 = vmul.f32 %v2287_v62, %v1810_v56 }
 0x9dc   : > { %v1826_v2 = vmul.f32 %v1974_v63, %v1818_v0 }
 0x9de   : > { %v1834_v4 = vadd.f32 %v1975_v1, %v1826_v2 }
 0x9e0   : > { %1835 = vst.msk [vmem:[%s585_s24] sm:$0xff] %vm617_vm1, %v1834_v4 }
 0x9e1   : > { %2301 = shalt.err (!%p2298_p5)
}
 0x9e2   : > { %s2302_s20 = scalar_lea.hbm %s2776_s30, 128  ;;  %s2306_s24 = scalar_lea.hbm %s2841_s17, 256 }
 0x9e3   : > { %p2303_p6 = scmp.ne.s32.totalorder %s2776_s30, %s2302_s20  ;;  %p2307_p10 = scmp.lt.u32.totalorder %s2776_s30, %s2841_s17 }
 0x9e4   : > { %p2308_p11 = scmp.lt.u32.totalorder %s2306_s24, %s2302_s20  ;;  %p2310_p13 = scmp.lt.u32.totalorder %s2302_s20, %s2776_s30 }
 0x9e5   : > { %p2304_p7 = pnand %p2303_p6, %p2512_p4 }
 0x9e6   : > { %p2309_p12 = por %p2308_p11, %p2307_p10 }
 0x9e7   : > { %p2305_p9 = pneg %p2304_p7 }
 0x9e8   : > { %p2311_p0 = por %p2310_p13, %p2309_p12 }
 0x9ea   : > { %p2312_p1 = pnand %p2311_p0, %p2305_p9 }
 0x9ec   : > { %2315 = shalt.err (!%p2312_p1)
}
 0x9ed   : > { %2200 = dma.vmem_to_hbm [thread:$0]  (%p2512_p4), %s2778_s0, 128, %s2776_s30, %s1837_s28  }
 0x9ee PF: > { %s2861_s18 = sld [smem:[#allocation9_spill]]  ;;  %p2206_p2 = scmp.ge.s32.totalorder %s2366_s29, 2 }
 0x9f0   : > { %p2203_p3 = pnand %p2206_p2, %p2519_p8 }
 0x9f4   : > { %s1863_s19 = sand.u32 1, %s2861_s18  }
 0x9f5   : > { %s1864_s5 = scalar_lea.sflag [#allocation7], %s1863_s19 }
 0x9f6   : > { %2341 = dma.done.wait (!%p2203_p3), %s1864_s5, 128  }
 0x9f7   : > { %2343 = vsyncadd (!%p2203_p3), %s1864_s5, 4294967168  ;;  %s30_s29 = sadd.s32 1, %s2366_s29   ;;  %s2863_s20 = sld [smem:[#allocation10_spill]] }
 0x9f8   : > { %p27_p5 = scmp.ge.s32.totalorder %s30_s29, 4   ;;  %s2864_s26 = sld [smem:[#allocation14_spill]] }
 0x9f9   : > { %s2865_s27 = sld [smem:[#allocation11_spill]]  ;;  %s2866_s28 = sld [smem:[#allocation12_spill]] }
 0x9fa   : > { %s2867_s24 = smov %s2350_s25  ;;  %29 = sbr.rel (!%p27_p5) target bundleno = 8 (0x8), region = 142 }
 0x9fd   : > { %s2868_s25 = smov %s2863_s20 }
 0xa01   :  { %1869 = vsyncpa [#allocation7], 1 }
 0xa02   :  { %1871 = vsyncpa [#allocation7 + $0x1], 1 }

// kernel: tpu_custom_call.1
= control target key start
LH: loop header
LB: loop body
LE: loop exit
PB: predicated region body
PF: predicated region fallthrough
CT: control target
= control target key end

     0   :  { %s2824_s0 = inlined_call_operand.vmem [shape: f32[2,8,32], index: 0, kind: input, shape index: {}]   ;;  %s2825_s1 = inlined_call_operand.vmem [shape: f32[2,8,32], index: 1, kind: input, shape index: {}]   ;;  %s2826_s2 = inlined_call_operand.vmem [shape: f32[2,1,8], index: 2, kind: input, shape index: {}]   ;;  %s2827_s3 = inlined_call_operand.vmem [shape: f32[32,32], index: 3, kind: input, shape index: {}]   ;;  %s2828_s4 = inlined_call_operand.vmem [shape: f32[1,32], index: 4, kind: input, shape index: {}]   ;;  %s2829_s5 = inlined_call_operand.vmem [shape: f32[32,64], index: 5, kind: input, shape index: {}]   ;;  %s2830_s6 = inlined_call_operand.vmem [shape: f32[1,64], index: 6, kind: input, shape index: {}]   ;;  %s2831_s7 = inlined_call_operand.vmem [shape: f32[32,32], index: 7, kind: input, shape index: {}]   ;;  %s2832_s8 = inlined_call_operand.vmem [shape: f32[1,32], index: 8, kind: input, shape index: {}]   ;;  %s2833_s9 = inlined_call_operand.vmem [shape: f32[1,32], index: 9, kind: input, shape index: {}]   ;;  %s2834_s10 = inlined_call_operand.vmem [shape: f32[1,32], index: 10, kind: input, shape index: {}]   ;;  %s2835_s11 = inlined_call_operand.vmem [shape: f32[32,128], index: 11, kind: input, shape index: {}]   ;;  %s2836_s12 = inlined_call_operand.vmem [shape: f32[1,128], index: 12, kind: input, shape index: {}]   ;;  %s2837_s13 = inlined_call_operand.vmem [shape: f32[128,32], index: 13, kind: input, shape index: {}]   ;;  %s2838_s14 = inlined_call_operand.vmem [shape: f32[1,32], index: 14, kind: input, shape index: {}]   ;;  %s2839_s15 = inlined_call_operand.vmem [shape: f32[1,32], index: 15, kind: input, shape index: {}]   ;;  %s2840_s16 = inlined_call_operand.vmem [shape: f32[1,32], index: 16, kind: input, shape index: {}]   ;;  %s2841_s17 = inlined_call_operand.hbm [shape: f32[2,8,32], index: 17, kind: output, shape index: {}]  }
   0x1   :  { %2847 = sst [smem:[#allocation15_spill]] %s2824_s0 }
   0x2   :  { %2848 = sst [smem:[#allocation16_spill]] %s2825_s1 }
   0x3   :  { %2849 = sst [smem:[#allocation17_spill]] %s2829_s5 }
   0x4   :  { %22 = vsyncpa [#allocation7], 0 }
   0x5   :  { %24 = vsyncpa [#allocation7 + $0x1], 0  ;;  %s2472_s24 = smov 0   ;;  %s2474_s25 = smov 0  }
   0x6   :  { %s2476_s26 = smov 0   ;;  %s2478_s27 = smov 0  }
   0x7   :  { %s2480_s28 = smov 0   ;;  %s2482_s29 = smov 0  }
   0x8 LB: > { %2850 = sst [smem:[#allocation9_spill]] %s2346_s24  ;;  %s1943_s0 = sadd.s32 4294967295, %s2366_s29   ;;  %s2366_s29 = sphi %s2482_s29, %s30_s29   ;;  %s2362_s28 = sphi %s2480_s28, %s2866_s28   ;;  %s2358_s27 = sphi %s2478_s27, %s2865_s27   ;;  %s2354_s26 = sphi %s2476_s26, %s2864_s26   ;;  %s2350_s25 = sphi %s2474_s25, %s2868_s25   ;;  %s2346_s24 = sphi %s2472_s24, %s2867_s24  }
   0x9   : > { %2851 = sst [smem:[#allocation10_spill]] %s2354_s26  ;;  %s1944_s30 = sadd.s32 4294967294, %s2366_s29  }
   0xa   : > { %2852 = sst [smem:[#allocation11_spill]] %s2362_s28  ;;  %s42_s18 = sadd.s32 1, %s2362_s28 }
   0xb   : > { %s425_s19 = sadd.s32 1, %s2354_s26  ;;  %p44_p0 = scmp.ge.s32.totalorder %s42_s18, 2 }
   0xc   : > { %p435_p1 = scmp.ne.s32.totalorder %s2354_s26, %s2350_s25  ;;  %p436_p2 = scmp.eq.s32.totalorder %s1943_s0, 1 }
   0xd   : > { %p441_p3 = scmp.ne.s32.totalorder %s2350_s25, %s2346_s24  ;;  %s2870_s18 = smov (%p44_p0, %s42_s18), 0 }
   0xe   : > { %2853 = sst [smem:[#allocation12_spill]] %s2870_s18  ;;  %p2512_p4 = por %p436_p2, %p435_p1 }
   0xf   : > { %p442_p5 = scmp.eq.s32.totalorder %s1944_s30, 1  ;;  %s420_s20 = ssub.s32 %s2362_s28, %s2870_s18 }
  0x10   : > { %p1947_p6 = scmp.ge.s32.totalorder %s2366_s29, 1  ;;  %p423_p7 = scmp.eq.s32.totalorder %s420_s20, 0 }
  0x11   : > { %p2519_p8 = por %p442_p5, %p441_p3  ;;  %p525_p9 = scmp.lt.s32.totalorder %s2366_s29, 3 }
  0x12   : > { %s2525_s22 = scalar_select %p423_p7, %s2354_s26, %s425_s19  }
  0x13   : > { %s2855_s21 = scalar_select %p2519_p8, 1, 0 }
  0x14   : > { %2857 = sst [smem:[#allocation14_spill]] %s2525_s22  ;;  %p526_p10 = pnand %p1947_p6, %p525_p9 }
  0x15   : > { %2856 = sst [smem:[#allocation13_spill]] %s2855_s21  ;;  %s2858_s5 = sld [smem:[#allocation17_spill]] (!%p526_p10)  ;;  %v2368_v3 = vmov (!%p526_p10), 0.0|0.0   ;;  %vm2369_vm0 = vmmov (!%p526_p10), 0   ;;  %v2370_v6 = vmov (!%p526_p10), 0.0   ;;  %v728_v8 = vld [vmem:[%s2827_s3] sm:$0xff] (!%p526_p10)  ;;  %v843_v38 = vlaneseq (!%p526_p10) }
  0x16   : > { %529 = sbr.rel (%p526_p10) target bundleno = 2542 (0x9ee), region = 88  ;;  %2152 = vmatprep.subr.bf16.mxu1 (!%p526_p10), %v2368_v3  ;;  %2041 = vmatprep.mubr.msk.f32.mxu1 (!%p526_p10), %vm2369_vm0, %v2370_v6  ;;  %p586_p11 = scmp.lt.s32.totalorder (!%p526_p10), %s2358_s27, 1  ;;  %v729_v9 = vld [vmem:[%s2827_s3 + $0x8] sm:$0xff] (!%p526_p10)  ;;  %vm617_vm1 = vcmask (!%p526_p10), 261120   ;;  %v730_v12 = vld [vmem:[%s2827_s3 + $0x10] sm:$0xff] (!%p526_p10)  ;;  %v731_v13 = vld [vmem:[%s2827_s3 + $0x18] sm:$0xff] (!%p526_p10) }
  0x17   : > { %2055 = vmatprep.subr.mxu0 (!%p526_p10), %v2370_v6  ;;  %2057 = vmatprep.mubr.msk.f32.mxu0 (!%p526_p10), %vm2369_vm0, %v2370_v6  ;;  %v2159_v11 = vpack.c.bf16 (!%p526_p10), %v729_v9, %v728_v8  ;;  %v2162_v14 = vpack.c.bf16 (!%p526_p10), %v731_v13, %v730_v12  ;;  %s2860_s23 = sld [smem:[#allocation15_spill]] (!%p526_p10)  ;;  %v1951_v16 = vld [vmem:[%s2830_s6] ss:$0 sm:$0xff] (!%p526_p10)  ;;  %vm691_vm2 = vcmask (!%p526_p10), 64512   ;;  %s2372_s20 = smov (!%p526_p10), 120   ;;  %v844_v40 = vshrl.u32 (!%p526_p10), %v843_v38, 7 }
  0x18   : > { %v1953_v20 = vld [vmem:[%s2828_s4] ss:$0 sm:$0xff] (!%p526_p10)  ;;  %s2373_s18 = smov (!%p526_p10), 112   ;;  %s2376_s26 = smov (!%p526_p10), 72   ;;  %vm1497_vm4 = vcmask (!%p526_p10), 130112   ;;  %vm1503_vm5 = vcmask (!%p526_p10), 195712  }
  0x19   : > { %v845_v41 = vsub.s32 (!%p526_p10), 0, %v844_v40  ;;  %s2377_s21 = smov (!%p526_p10), 88   ;;  %vm1509_vm6 = vcmask (!%p526_p10), 261312  }
  0x1b   : > { %v606_v0 = vld [vmem:[%s2858_s5] sm:$0xff] (!%p526_p10)  ;;  %v607_v1 = vld [vmem:[%s2858_s5 + $0x8] sm:$0xff] (!%p526_p10)  ;;  %v608_v2 = vld [vmem:[%s2858_s5 + $0x10] sm:$0xff] (!%p526_p10) }
  0x1c   : > { %v2153_v4 = vpack.c.bf16 (!%p526_p10), %v607_v1, %v606_v0  ;;  %v609_v5 = vld [vmem:[%s2858_s5 + $0x18] sm:$0xff] (!%p526_p10)  ;;  %s2859_s5 = sld [smem:[#allocation16_spill]] (!%p526_p10) }
  0x1d   : > { %v2156_v7 = vpack.c.bf16 %v609_v5, %v608_v2  ;;  %s2547_s24 = scalar_select %p586_p11, %s2358_s27, 1 }
  0x1e   : > { %2154 = vmatpush3.bf16.msra.mxu1 %v2153_v4 }
  0x1f   : > { %2155 = vmatprep.subr.bf16.mxu1 %v2368_v3  ;;  %s1949_s30 = sshll.u32 %s2547_s24, 3 }
  0x20   : > { %s592_s0 = scalar_lea.vmem %s2860_s23, %s1949_s30  ;;  %s599_s23 = scalar_lea.vmem %s2826_s2, %s2547_s24 }
  0x21   : > { %v2574_v15 = vld [vmem:[%s592_s0] sm:$0xff]  ;;  %s2374_s24 = smov 96   ;;  %s2375_s0 = smov 80  }
  0x22   : > { %s596_s22 = scalar_lea.vmem %s2859_s5, %s1949_s30  ;;  %2157 = vmatpush3.bf16.msra.mxu1 %v2156_v7  ;;  %s2371_s30 = smov 104   ;;  %v839_v39 = vld [vmem:[%s599_s23] sm:$0x1] }
  0x23   : > { %v605_v10 = vld [vmem:[%s596_s22] sm:$0xff]  ;;  %2158 = vmatprep.subr.bf16.mxu1 %v2368_v3  ;;  %vm840_vm3 = vcmp.eq.f32.partialorder %v839_v39, 0.0  ;;  %s1977_s23 = sshll.u32 %s2358_s27, 7  ;;  %s2381_s27 = smov [#allocation6]  }
  0x24   : > { %v841_v42 = vsel %vm840_vm3, -1e+30, %v2370_v6 }
  0x25   : > { %2042 = vmatmul.mubr.msk.f32.vlgmr.msra.gmra.mrb[0].mxu1 %vm617_vm1, %v605_v10  ;;  %v846_v43 = vrot.slane %v841_v42, %v845_v41  ;;  %v1512_v41 = vld [vmem:[%s2831_s7] sm:$0xff]  ;;  %v1513_v42 = vld [vmem:[%s2831_s7 + $0x8] sm:$0xff] }
  0x26   : > { %2160 = vmatpush3.bf16.msra.mxu1 %v2159_v11  ;;  %2052 = vmatprep.mubr.msk.f32.mxu1 %vm2369_vm0, %v2370_v6 }
  0x27   : > { %2161 = vmatprep.subr.bf16.mxu1 %v2368_v3 }
  0x2a   : > { %2163 = vmatpush3.bf16.msra.mxu1 %v2162_v14 }
  0x2b   : > { %2060 = vmatprep.subr.mxu1 %v2370_v6 }
  0x2d   : > { %2053 = vmatmul.mubr.msk.f32.vlgmr.msra.gmra.mrb[2].mxu1 %vm617_vm1, %v2574_v15 }
  0x2e   : > { %2062 = vmatprep.mubr.msk.f32.mxu1 %vm2369_vm0, %v2370_v6 }
  0xf8   : > { %v687_v17 = vpop.f32.mrb[0].mxu1 }
  0xf9   : > { %v2584_v18 = vadd.f32 %v1951_v16, %v687_v17  ;;  %v2043_v19 = vpop.f32.mrb[1].mxu1 }
  0xfb   : > { %692 = vst.msk [vmem:[#allocation3] sm:$0xff] %vm691_vm2, %v2584_v18  ;;  %718 = vrot.lane.b32.xlu1 %v2584_v18, %s2371_s30  ;;  %698 = vrot.lane.b32.xlu0 %v2584_v18, %s2372_s20 }
  0xff   : > { %708 = vrot.lane.b32.xlu0 %v2584_v18, %s2373_s18 }
 0x100   : > { %v809_v21 = vpop.f32.mrb[2].mxu1 }
 0x101   : > { %v810_v22 = vadd.f32 %v1953_v20, %v809_v21  ;;  %v2054_v23 = vpop.f32.mrb[3].mxu1 }
 0x102   : > { %v835_v24 = vld [vmem:[#allocation3] sm:$0xff] }
 0x103   : > { %814 = vst.msk [vmem:[#allocation2] sm:$0xff] %vm691_vm2, %v810_v22  ;;  %2056 = vmatpush3.xpose.msk.msra.mxu0 %vm691_vm2, %v835_v24  ;;  %821 = vrot.lane.b32.xlu0 %v810_v22, %s2373_s18 }
 0x104   : > { %816 = vrot.lane.b32.xlu1 %v810_v22, %s2372_s20  ;;  %2065 = vmatprep.subr.mxu0 %v2370_v6  ;;  %s583_s20 = sand.u32 1, %s2350_s25  }
 0x105   : > { %s1948_s19 = sshll.u32 %s583_s20, 3  ;;  %s1837_s28 = scalar_lea.sflag [#allocation7], %s583_s20 }
 0x108   : > { %826 = vrot.lane.b32.xlu1 %v810_v22, %s2371_s30  ;;  %s2776_s30 = scalar_lea.hbm %s2841_s17, %s1977_s23 }
 0x10a   : > { %v831_v25 = vld [vmem:[#allocation2] sm:$0xff] }
 0x10b   : > { %2058 = vmatmul.mubr.msk.f32.vlgmr.msra.gmra.mrb[0].mxu0 %vm691_vm2, %v831_v25 }
 0x10c   : > { %2067 = vmatprep.mubr.msk.f32.mxu0 %vm2369_vm0, %v2370_v6 }
 0x16d   : > { %v719_v26 = vpop.permute.xlu1 %718  ;;  %v699_v27 = vpop.permute.xlu0 %698 }
 0x16e   : > { %722 = vst.msk [vmem:[#allocation3 + $0x18] sm:$0xff] %vm691_vm2, %v719_v26  ;;  %702 = vst.msk [vmem:[#allocation3 + $0x8] sm:$0xff] %vm691_vm2, %v699_v27 }
 0x171   : > { %v709_v28 = vpop.permute.xlu0 %708 }
 0x172   : > { %712 = vst.msk [vmem:[#allocation3 + $0x10] sm:$0xff] %vm691_vm2, %v709_v28 }
 0x175   : > { %v822_v29 = vpop.permute.xlu0 %821  ;;  %v836_v30 = vld [vmem:[#allocation3 + $0x8] sm:$0xff]  ;;  %v838_v36 = vld [vmem:[#allocation3 + $0x18] sm:$0xff] }
 0x176   : > { %825 = vst.msk [vmem:[#allocation2 + $0x10] sm:$0xff] %vm691_vm2, %v822_v29  ;;  %v817_v31 = vpop.permute.xlu1 %816  ;;  %2061 = vmatpush3.xpose.msk.msra.mxu1 %vm691_vm2, %v836_v30 }
 0x177   : > { %820 = vst.msk [vmem:[#allocation2 + $0x8] sm:$0xff] %vm691_vm2, %v817_v31  ;;  %2070 = vmatprep.subr.mxu1 %v2370_v6 }
 0x179   : > { %v837_v32 = vld [vmem:[#allocation3 + $0x10] sm:$0xff] }
 0x17a   : > { %v827_v33 = vpop.permute.xlu1 %826  ;;  %2066 = vmatpush3.xpose.msk.msra.mxu0 %vm691_vm2, %v837_v32 }
 0x17b   : > { %830 = vst.msk [vmem:[#allocation2 + $0x18] sm:$0xff] %vm691_vm2, %v827_v33  ;;  %2075 = vmatprep.subr.mxu0 %v2370_v6 }
 0x17d   : > { %v833_v34 = vld [vmem:[#allocation2 + $0x10] sm:$0xff] }
 0x17e   : > { %v832_v35 = vld [vmem:[#allocation2 + $0x8] sm:$0xff]  ;;  %2068 = vmatmul.mubr.msk.f32.vlgmr.msra.gmra.mrb[2].mxu0 %vm691_vm2, %v833_v34 }
 0x17f   : > { %2063 = vmatmul.mubr.msk.f32.vlgmr.msra.gmra.mrb[4].mxu1 %vm691_vm2, %v832_v35  ;;  %2077 = vmatprep.mubr.msk.f32.mxu0 %vm2369_vm0, %v2370_v6 }
 0x180   : > { %2071 = vmatpush3.xpose.msk.msra.mxu1 %vm691_vm2, %v838_v36  ;;  %2072 = vmatprep.mubr.msk.f32.mxu1 %vm2369_vm0, %v2370_v6 }
 0x181   : > { %2080 = vmatprep.subr.mxu1 %v2370_v6 }
 0x182   : > { %v834_v37 = vld [vmem:[#allocation2 + $0x18] sm:$0xff] }
 0x183   : > { %2073 = vmatmul.mubr.msk.f32.vlgmr.msra.gmra.mrb[6].mxu1 %vm691_vm2, %v834_v37 }
 0x184   : > { %2082 = vmatprep.mubr.msk.f32.mxu1 %vm2369_vm0, %v2370_v6 }
 0x1de   : > { %v920_v44 = vpop.f32.mrb[0].mxu0 }
 0x1df   : > { %v921_v45 = vadd.f32 %v920_v44, %v846_v43  ;;  %v2059_v46 = vpop.f32.mrb[1].mxu0  ;;  %v1514_v44 = vld [vmem:[%s2831_s7 + $0x10] sm:$0xff] }
 0x1e1   : > { %v1152_v47 = vsel %vm691_vm2, %v921_v45, -inf }
 0x1e2   : > { %1153 = vmax.xlane.f32.xlu0 %v1152_v47 }
 0x251   : > { %v1072_v48 = vpop.f32.mrb[2].mxu0 }
 0x252   : > { %v996_v49 = vpop.f32.mrb[4].mxu1  ;;  %v1073_v50 = vadd.f32 %v1072_v48, %v846_v43  ;;  %v2069_v51 = vpop.f32.mrb[3].mxu0 }
 0x253   : > { %v997_v52 = vadd.f32 %v996_v49, %v846_v43  ;;  %v2064_v53 = vpop.f32.mrb[5].mxu1 }
 0x254   : > { %v1158_v54 = vsel %vm691_vm2, %v1073_v50, -inf }
 0x255   : > { %1159 = vmax.xlane.f32.xlu0 %v1158_v54  ;;  %v1155_v55 = vsel %vm691_vm2, %v997_v52, -inf }
 0x256   : > { %1156 = vmax.xlane.f32.xlu1 %v1155_v55  ;;  %v1148_v56 = vpop.f32.mrb[6].mxu1 }
 0x257   : > { %v1149_v57 = vadd.f32 %v1148_v56, %v846_v43  ;;  %v2074_v58 = vpop.f32.mrb[7].mxu1  ;;  %v2165_v43 = vpack.c.bf16 %v1513_v42, %v1512_v41  ;;  %v1727_v41 = vld [vmem:[%s2837_s13 + $0x78] sm:$0xff] }
 0x259   : > { %v1161_v59 = vsel %vm691_vm2, %v1149_v57, -inf }
 0x25a   : > { %1162 = vmax.xlane.f32.xlu0 %v1161_v59 }
 0x267   : > { %694 = vrot.lane.b32.xlu1 %v2584_v18, %s2374_s24  ;;  %s2378_s24 = smov 16  }
 0x26f   : > { %v1154_v60 = vpop.xlane.xlu0 %1153 }
 0x270   : > { %v1164_v61 = vsub.f32 %v921_v45, %v1154_v60  ;;  %v1515_v45 = vld [vmem:[%s2831_s7 + $0x18] sm:$0xff] }
 0x271   : > { %v2168_v46 = vpack.c.bf16 %v1515_v45, %v1514_v44 }
 0x272   : > { %v1168_v62 = vmul.f32 1.442695, %v1164_v61 }
 0x274   : > { %2268 = vpow2.f32 %v1168_v62 }
 0x27e   : > { %v2269_v63 = vpop.eup %2268 }
 0x27f   : > { %v1176_v0 = vsel %vm691_vm2, %v2269_v63, 0.0 }
 0x28b   : > { %1177 = vadd.xlane.f32.xlu1 %v1176_v0 }
 0x2e2   : > { %v1160_v1 = vpop.xlane.xlu0 %1159 }
 0x2e3   : > { %v1166_v2 = vsub.f32 %v1073_v50, %v1160_v1  ;;  %v1157_v4 = vpop.xlane.xlu1 %1156 }
 0x2e4   : > { %v1165_v5 = vsub.f32 %v997_v52, %v1157_v4 }
 0x2e5   : > { %v1172_v7 = vmul.f32 1.442695, %v1166_v2 }
 0x2e6   : > { %v1170_v8 = vmul.f32 1.442695, %v1165_v5  ;;  %v1628_v5 = vld [vmem:[%s2835_s11 + $0x8] sm:$0xff] }
 0x2e7   : > { %2270 = vpow2.f32 %v1172_v7  ;;  %v695_v9 = vpop.permute.xlu1 %694  ;;  %v1163_v10 = vpop.xlane.xlu0 %1162 }
 0x2e8   : > { %2272 = vpow2.f32 %v1170_v8  ;;  %697 = vst.msk [vmem:[#allocation4] sm:$0xff] %vm691_vm2, %v695_v9  ;;  %v1167_v11 = vsub.f32 %v1149_v57, %v1163_v10  ;;  %v1967_v57 = vld [vmem:[%s2832_s8] ss:$0 sm:$0xff]  ;;  %v1630_v8 = vld [vmem:[%s2835_s11 + $0x18] sm:$0xff] }
 0x2e9   : > { %v1712_v10 = vld [vmem:[%s2837_s13] sm:$0xff] }
 0x2ea   : > { %v1174_v12 = vmul.f32 1.442695, %v1167_v11  ;;  %v1713_v11 = vld [vmem:[%s2837_s13 + $0x8] sm:$0xff] }
 0x2ec   : > { %2274 = vpow2.f32 %v1174_v12  ;;  %v1714_v12 = vld [vmem:[%s2837_s13 + $0x10] sm:$0xff] }
 0x2ef   : > { %v1196_v13 = vld [vmem:[#allocation4] sm:$0xff] }
 0x2f0   : > { %2076 = vmatpush3.msra.mxu0 %v1196_v13  ;;  %v2177_v13 = vpack.c.bf16 %v1713_v11, %v1712_v10 }
 0x2f1   : > { %v2271_v14 = vpop.eup %2270  ;;  %2085 = vmatprep.subr.mxu0 %v2370_v6 }
 0x2f2   : > { %v2273_v16 = vpop.eup %2272  ;;  %v1182_v17 = vsel %vm691_vm2, %v2271_v14, 0.0 }
 0x2f3   : > { %1183 = vadd.xlane.f32.xlu1 %v1182_v17  ;;  %v1179_v19 = vsel %vm691_vm2, %v2273_v16, 0.0  ;;  %v1716_v17 = vld [vmem:[%s2837_s13 + $0x20] sm:$0xff] }
 0x2f4   : > { %1180 = vadd.xlane.f32.xlu0 %v1179_v19  ;;  %v1717_v19 = vld [vmem:[%s2837_s13 + $0x28] sm:$0xff] }
 0x2f6   : > { %v2275_v20 = vpop.eup %2274 }
 0x2f7   : > { %v1185_v21 = vsel %vm691_vm2, %v2275_v20, 0.0 }
 0x2f8   : > { %1186 = vadd.xlane.f32.xlu0 %v1185_v21  ;;  %v1718_v21 = vld [vmem:[%s2837_s13 + $0x30] sm:$0xff] }
 0x304   : > { %713 = vrot.lane.b32.xlu1 %v2584_v18, %s2375_s0  ;;  %s2379_s0 = smov 8  }
 0x308   : > { %723 = vrot.lane.b32.xlu1 %v2584_v18, %s2376_s26  ;;  %s2380_s26 = smov 24  }
 0x30e   : > { %703 = vrot.lane.b32.xlu0 %v2584_v18, %s2377_s21 }
 0x318   : > { %v1178_v22 = vpop.xlane.xlu1 %1177 }
 0x319   : > { %2276 = vrcp.f32 %v1178_v22  ;;  %v1719_v22 = vld [vmem:[%s2837_s13 + $0x38] sm:$0xff] }
 0x323   : > { %v2277_v23 = vpop.eup %2276 }
 0x324   : > { %v1192_v24 = vmul.f32 %v2277_v23, %v2269_v63  ;;  %v2186_v23 = vpack.c.bf16 %v1719_v22, %v1718_v21 }
 0x326   : > { %2078 = vmatmul.mubr.msk.f32.vlgmr.msra.gmra.mrb[4].mxu0 %vm691_vm2, %v1192_v24  ;;  %v1720_v24 = vld [vmem:[%s2837_s13 + $0x40] sm:$0xff] }
 0x327   : > { %2087 = vmatprep.mubr.msk.f32.mxu0 %vm2369_vm0, %v2370_v6 }
 0x380   : > { %v1184_v25 = vpop.xlane.xlu1 %1183 }
 0x381   : > { %2278 = vrcp.f32 %v1184_v25  ;;  %v1181_v26 = vpop.xlane.xlu0 %1180  ;;  %v1721_v25 = vld [vmem:[%s2837_s13 + $0x48] sm:$0xff] }
 0x382   : > { %2280 = vrcp.f32 %v1181_v26  ;;  %v2189_v26 = vpack.c.bf16 %v1721_v25, %v1720_v24 }
 0x384   : > { %v714_v27 = vpop.permute.xlu1 %713 }
 0x385   : > { %717 = vst.msk [vmem:[#allocation4 + $0x10] sm:$0xff] %vm691_vm2, %v714_v27  ;;  %v1187_v28 = vpop.xlane.xlu0 %1186  ;;  %v1722_v27 = vld [vmem:[%s2837_s13 + $0x50] sm:$0xff] }
 0x386   : > { %2282 = vrcp.f32 %v1187_v28  ;;  %v1723_v28 = vld [vmem:[%s2837_s13 + $0x58] sm:$0xff] }
 0x388   : > { %v724_v29 = vpop.permute.xlu1 %723 }
 0x389   : > { %727 = vst.msk [vmem:[#allocation4 + $0x18] sm:$0xff] %vm691_vm2, %v724_v29  ;;  %v704_v18 = vpop.permute.xlu0 %703  ;;  %v2192_v29 = vpack.c.bf16 %v1723_v28, %v1722_v27 }
 0x38a   : > { %707 = vst.msk [vmem:[#allocation4 + $0x8] sm:$0xff] %vm691_vm2, %v704_v18  ;;  %v1724_v18 = vld [vmem:[%s2837_s13 + $0x60] sm:$0xff] }
 0x38b   : > { %v2279_v30 = vpop.eup %2278 }
 0x38c   : > { %v1194_v31 = vmul.f32 %v2279_v30, %v2271_v14  ;;  %v1198_v32 = vld [vmem:[#allocation4 + $0x10] sm:$0xff]  ;;  %v2281_v33 = vpop.eup %2280  ;;  %v1715_v14 = vld [vmem:[%s2837_s13 + $0x18] sm:$0xff]  ;;  %v1725_v30 = vld [vmem:[%s2837_s13 + $0x68] sm:$0xff] }
 0x38d   : > { %2086 = vmatpush3.msra.mxu0 %v1198_v32  ;;  %v1193_v34 = vmul.f32 %v2281_v33, %v2273_v16  ;;  %v2180_v16 = vpack.c.bf16 %v1715_v14, %v1714_v12 }
 0x38e   : > { %2088 = vmatmul.mubr.msk.f32.vlgmr.msra.gmra.mrb[6].mxu0 %vm691_vm2, %v1194_v31  ;;  %2176 = vmatprep.subr.bf16.mxu0 %v2368_v3  ;;  %v2195_v31 = vpack.c.bf16 %v1725_v30, %v1724_v18 }
 0x38f   : > { %2149 = vmatprep.mubr.msk.f32.mxu0 %vm2369_vm0, %v2370_v6  ;;  %2178 = vmatpush3.bf16.msra.mxu0 %v2177_v13 }
 0x390   : > { %v2283_v36 = vpop.eup %2282  ;;  %v1199_v37 = vld [vmem:[#allocation4 + $0x18] sm:$0xff]  ;;  %2179 = vmatprep.subr.bf16.mxu0 %v2368_v3 }
 0x391   : > { %v1197_v35 = vld [vmem:[#allocation4 + $0x8] sm:$0xff]  ;;  %v1195_v38 = vmul.f32 %v2283_v36, %v2275_v20  ;;  %v2183_v20 = vpack.c.bf16 %v1717_v19, %v1716_v17  ;;  %v1969_v36 = vld [vmem:[%s2833_s9] ss:$0 sm:$0xff] }
 0x392   : > { %2081 = vmatpush3.msra.mxu1 %v1197_v35 }
 0x393   : > { %2083 = vmatmul.mubr.msk.f32.vlgmr.msra.gmra.mrb[8].mxu1 %vm691_vm2, %v1193_v34  ;;  %2090 = vmatprep.subr.mxu1 %v2370_v6 }
 0x394   : > { %2091 = vmatpush3.msra.mxu1 %v1199_v37  ;;  %2092 = vmatprep.mubr.msk.f32.mxu1 %vm2369_vm0, %v2370_v6 }
 0x395   : > { %2164 = vmatprep.subr.bf16.mxu1 %v2368_v3  ;;  %2181 = vmatpush3.bf16.msra.mxu0 %v2180_v16 }
 0x396   : > { %2182 = vmatprep.subr.bf16.mxu0 %v2368_v3 }
 0x397   : > { %2093 = vmatmul.mubr.msk.f32.vlgmr.msra.gmra.mrb[10].mxu1 %vm691_vm2, %v1195_v38  ;;  %v1970_v38 = vld [vmem:[%s2834_s10] ss:$0 sm:$0xff] }
 0x398   : > { %2103 = vmatprep.mubr.msk.f32.mxu1 %vm2369_vm0, %v2370_v6  ;;  %2166 = vmatpush3.bf16.msra.mxu1 %v2165_v43  ;;  %v1971_v43 = vld [vmem:[%s2836_s12] ss:$0 sm:$0xff] }
 0x399   : > { %2167 = vmatprep.subr.bf16.mxu1 %v2368_v3  ;;  %2184 = vmatpush3.bf16.msra.mxu0 %v2183_v20 }
 0x39a   : > { %2185 = vmatprep.subr.bf16.mxu0 %v2368_v3 }
 0x39c   : > { %2169 = vmatpush3.bf16.msra.mxu1 %v2168_v46 }
 0x39d   : > { %2170 = vmatprep.subr.bf16.mxu1 %v2368_v3  ;;  %2187 = vmatpush3.bf16.msra.mxu0 %v2186_v23 }
 0x39e   : > { %2188 = vmatprep.subr.bf16.mxu0 %v2368_v3 }
 0x3a1   : > { %2190 = vmatpush3.bf16.msra.mxu0 %v2189_v26 }
 0x3a2   : > { %2191 = vmatprep.subr.bf16.mxu0 %v2368_v3 }
 0x3a5   : > { %2193 = vmatpush3.bf16.msra.mxu0 %v2192_v29 }
 0x3a6   : > { %2194 = vmatprep.subr.bf16.mxu0 %v2368_v3 }
 0x3a9   : > { %2196 = vmatpush3.bf16.msra.mxu0 %v2195_v31 }
 0x3aa   : > { %2197 = vmatprep.subr.bf16.mxu0 %v2368_v3 }
 0x3f9   : > { %v1269_v39 = vpop.f32.mrb[4].mxu0 }
 0x3fa   : > { %1492 = vst.msk [vmem:[#allocation5] sm:$0xff] %vm691_vm2, %v1269_v39  ;;  %v2079_v40 = vpop.f32.mrb[5].mxu0 }
 0x461   : > { %v1415_v47 = vpop.f32.mrb[6].mxu0 }
 0x462   : > { %1500 = vrot.lane.b32.xlu1 %v1415_v47, %s2378_s24  ;;  %v2089_v48 = vpop.f32.mrb[7].mxu0  ;;  %s585_s24 = scalar_lea.vmem [#allocation6], %s1948_s19  ;;  %s2292_s19 = sshll.u32 %s2381_s27, 4  ;;  %s2293_s19 = int_to_ptr.vmem [resolvable:$false] %s2292_s19 }
 0x463   : > { %v1973_v48 = vld [vmem:[%s2838_s14] ss:$0 sm:$0xff]  ;;  %s2294_s5 = scalar_lea.vmem %s2293_s19, 256 }
 0x466   : > { %v1342_v49 = vpop.f32.mrb[8].mxu1 }
 0x467   : > { %1494 = vrot.lane.b32.xlu0 %v1342_v49, %s2379_s0  ;;  %v2084_v50 = vpop.f32.mrb[9].mxu1  ;;  %s1851_s0 = sshll.u32 %s585_s24, 4  ;;  %s2778_s0 = int_to_ptr.vmem [resolvable:$true] %s1851_s0 }
 0x468   : > { %s2288_s18 = scalar_lea.vmem %s2778_s0, 128  ;;  %p2295_p1 = scmp.lt.s32.totalorder %s2778_s0, %s2293_s19 }
 0x469   : > { %p2289_p12 = scmp.ne.s32.totalorder %s2778_s0, %s2288_s18  ;;  %p2296_p2 = scmp.lt.s32.totalorder %s2294_s5, %s2288_s18 }
 0x46a   : > { %v1488_v51 = vpop.f32.mrb[10].mxu1 }
 0x46b   : > { %1506 = vrot.lane.b32.xlu0 %v1488_v51, %s2380_s26  ;;  %v2094_v52 = vpop.f32.mrb[11].mxu1  ;;  %p2290_p13 = pnand %p2289_p12, %p2512_p4  ;;  %p2297_p3 = por %p2296_p2, %p2295_p1 }
 0x46d   : > { %p2291_p0 = pneg %p2290_p13 }
 0x46f   : > { %p2298_p5 = pnand %p2297_p3, %p2291_p0 }
 0x4d4   : > { %v1501_v54 = vpop.permute.xlu1 %1500 }
 0x4d9   : > { %v1495_v53 = vpop.permute.xlu0 %1494 }
 0x4da   : > { %1498 = vst.msk [vmem:[#allocation5] sm:$0xff] %vm1497_vm4, %v1495_v53 }
 0x4db   : > { %1504 = vst.msk [vmem:[#allocation5] sm:$0xff] %vm1503_vm5, %v1501_v54 }
 0x4dd   : > { %v1507_v55 = vpop.permute.xlu0 %1506 }
 0x4de   : > { %1510 = vst.msk [vmem:[#allocation5] sm:$0xff] %vm1509_vm6, %v1507_v55 }
 0x4e5   : > { %v1511_v56 = vld [vmem:[#allocation5] sm:$0xff] }
 0x4e6   : > { %2104 = vmatmul.mubr.msk.f32.vlgmr.msra.gmra.mrb[12].mxu1 %vm617_vm1, %v1511_v56 }
 0x4e7   : > { %2114 = vmatprep.mubr.msk.f32.mxu1 %vm2369_vm0, %v2370_v6  ;;  %v1627_v6 = vld [vmem:[%s2835_s11] sm:$0xff] }
 0x4e8   : > { %v2171_v7 = vpack.c.bf16 %v1628_v5, %v1627_v6 }
 0x4ea   : > { %2172 = vmatpush3.bf16.msra.mxu1 %v2171_v7 }
 0x4eb   : > { %2173 = vmatprep.subr.bf16.mxu1 %v2368_v3  ;;  %v1726_v3 = vld [vmem:[%s2837_s13 + $0x70] sm:$0xff] }
 0x4ec   : > { %v2198_v42 = vpack.c.bf16 %v1727_v41, %v1726_v3 }
 0x4ee   : > { %2199 = vmatpush3.bf16.msra.mxu0 %v2198_v42 }
 0x5b9   : > { %v1592_v58 = vpop.f32.mrb[12].mxu1 }
 0x5ba   : > { %v1593_v59 = vadd.f32 %v1967_v57, %v1592_v58  ;;  %v2105_v60 = vpop.f32.mrb[13].mxu1 }
 0x5bc   : > { %v1596_v61 = vadd.f32 %v1593_v59, %v2574_v15  ;;  %v1629_v15 = vld [vmem:[%s2835_s11 + $0x10] sm:$0xff] }
 0x5bd   : > { %v2174_v9 = vpack.c.bf16 %v1630_v8, %v1629_v15 }
 0x5be   : > { %v1597_v62 = vsel %vm617_vm1, %v1596_v61, 0.0 }
 0x5bf   : > { %1598 = vadd.xlane.f32.xlu1 %v1597_v62  ;;  %2175 = vmatpush3.bf16.msra.mxu1 %v2174_v9 }
 0x64c   : > { %v1599_v63 = vpop.xlane.xlu1 %1598 }
 0x64d   : > { %v1601_v0 = vmul.f32 0.03125, %v1599_v63  ;;  %v1974_v63 = vld [vmem:[%s2839_s15] ss:$0 sm:$0xff] }
 0x64f   : > { %v1602_v1 = vsub.f32 %v1596_v61, %v1601_v0 }
 0x651   : > { %v1603_v2 = vmul.f32 %v1602_v1, %v1602_v1 }
 0x653   : > { %v1604_v4 = vsel %vm617_vm1, %v1603_v2, 0.0 }
 0x654   : > { %1605 = vadd.xlane.f32.xlu0 %v1604_v4 }
 0x6e1   : > { %v1606_v32 = vpop.xlane.xlu0 %1605 }
 0x6e2   : > { %v1607_v33 = vmul.f32 0.03125, %v1606_v32 }
 0x6e4   : > { %v1608_v34 = vadd.f32 1e-05, %v1607_v33 }
 0x6e6   : > { %2284 = vrsqrt.f32 %v1608_v34 }
 0x6f0   : > { %v2285_v35 = vpop.eup %2284 }
 0x6f1   : > { %v1610_v37 = vmul.f32 %v2285_v35, %v1602_v1  ;;  %v1975_v1 = vld [vmem:[%s2840_s16] ss:$0 sm:$0xff] }
 0x6f3   : > { %v1618_v39 = vmul.f32 %v1969_v36, %v1610_v37 }
 0x6f5   : > { %v1626_v40 = vadd.f32 %v1970_v38, %v1618_v39 }
 0x6f7   : > { %2115 = vmatmul.mubr.msk.f32.vlgmr.msra.gmra.mrb[14].mxu1 %vm617_vm1, %v1626_v40 }
 0x7ca   : > { %v1707_v44 = vpop.f32.mrb[14].mxu1 }
 0x7cb   : > { %v1708_v45 = vadd.f32 %v1971_v43, %v1707_v44  ;;  %v2116_v46 = vpop.f32.mrb[15].mxu1 }
 0x7cd   : > { %v1711_v47 = vmax.f32 %v1708_v45, 0.0 }
 0x7cf   : > { %2150 = vmatmul.mubr.f32.vlgmr.msra.gmra.mrb[8].mxu0 %v1711_v47 }
 0x8a2   : > { %v1801_v49 = vpop.f32.mrb[8].mxu0 }
 0x8a3   : > { %v1802_v50 = vadd.f32 %v1973_v48, %v1801_v49  ;;  %v2151_v51 = vpop.f32.mrb[9].mxu0 }
 0x8a5   : > { %v1805_v52 = vadd.f32 %v1802_v50, %v1626_v40 }
 0x8a7   : > { %v1806_v53 = vsel %vm617_vm1, %v1805_v52, 0.0 }
 0x8a8   : > { %1807 = vadd.xlane.f32.xlu0 %v1806_v53 }
 0x935   : > { %v1808_v54 = vpop.xlane.xlu0 %1807 }
 0x936   : > { %v1809_v55 = vmul.f32 0.03125, %v1808_v54 }
 0x938   : > { %v1810_v56 = vsub.f32 %v1805_v52, %v1809_v55 }
 0x93a   : > { %v1811_v57 = vmul.f32 %v1810_v56, %v1810_v56 }
 0x93c   : > { %v1812_v58 = vsel %vm617_vm1, %v1811_v57, 0.0 }
 0x93d   : > { %1813 = vadd.xlane.f32.xlu1 %v1812_v58 }
 0x9ca   : > { %v1814_v59 = vpop.xlane.xlu1 %1813 }
 0x9cb   : > { %v1815_v60 = vmul.f32 0.03125, %v1814_v59 }
 0x9cd   : > { %v1816_v61 = vadd.f32 1e-05, %v1815_v60 }
 0x9cf   : > { %2286 = vrsqrt.f32 %v1816_v61 }
 0x9d9   : > { %v2287_v62 = vpop.eup %2286 }
 0x9da   : > { %v1818_v0 = vmul.f32 %v2287_v62, %v1810_v56 }
 0x9dc   : > { %v1826_v2 = vmul.f32 %v1974_v63, %v1818_v0 }
 0x9de   : > { %v1834_v4 = vadd.f32 %v1975_v1, %v1826_v2 }
 0x9e0   : > { %1835 = vst.msk [vmem:[%s585_s24] sm:$0xff] %vm617_vm1, %v1834_v4 }
 0x9e1   : > { %2301 = shalt.err (!%p2298_p5)
}
 0x9e2   : > { %s2302_s20 = scalar_lea.hbm %s2776_s30, 128  ;;  %s2306_s24 = scalar_lea.hbm %s2841_s17, 256 }
 0x9e3   : > { %p2303_p6 = scmp.ne.s32.totalorder %s2776_s30, %s2302_s20  ;;  %p2307_p10 = scmp.lt.u32.totalorder %s2776_s30, %s2841_s17 }
 0x9e4   : > { %p2308_p11 = scmp.lt.u32.totalorder %s2306_s24, %s2302_s20  ;;  %p2310_p13 = scmp.lt.u32.totalorder %s2302_s20, %s2776_s30 }
 0x9e5   : > { %p2304_p7 = pnand %p2303_p6, %p2512_p4 }
 0x9e6   : > { %p2309_p12 = por %p2308_p11, %p2307_p10 }
 0x9e7   : > { %p2305_p9 = pneg %p2304_p7 }
 0x9e8   : > { %p2311_p0 = por %p2310_p13, %p2309_p12 }
 0x9ea   : > { %p2312_p1 = pnand %p2311_p0, %p2305_p9 }
 0x9ec   : > { %2315 = shalt.err (!%p2312_p1)
}
 0x9ed   : > { %2200 = dma.vmem_to_hbm [thread:$0]  (%p2512_p4), %s2778_s0, 128, %s2776_s30, %s1837_s28  }
 0x9ee PF: > { %s2861_s18 = sld [smem:[#allocation9_spill]]  ;;  %p2206_p2 = scmp.ge.s32.totalorder %s2366_s29, 2 }
 0x9f0   : > { %p2203_p3 = pnand %p2206_p2, %p2519_p8 }
 0x9f4   : > { %s1863_s19 = sand.u32 1, %s2861_s18  }
 0x9f5   : > { %s1864_s5 = scalar_lea.sflag [#allocation7], %s1863_s19 }
 0x9f6   : > { %2341 = dma.done.wait (!%p2203_p3), %s1864_s5, 128  }
 0x9f7   : > { %2343 = vsyncadd (!%p2203_p3), %s1864_s5, 4294967168  ;;  %s30_s29 = sadd.s32 1, %s2366_s29   ;;  %s2863_s20 = sld [smem:[#allocation10_spill]] }
 0x9f8   : > { %p27_p5 = scmp.ge.s32.totalorder %s30_s29, 4   ;;  %s2864_s26 = sld [smem:[#allocation14_spill]] }
 0x9f9   : > { %s2865_s27 = sld [smem:[#allocation11_spill]]  ;;  %s2866_s28 = sld [smem:[#allocation12_spill]] }
 0x9fa   : > { %s2867_s24 = smov %s2350_s25  ;;  %29 = sbr.rel (!%p27_p5) target bundleno = 8 (0x8), region = 142 }
 0x9fd   : > { %s2868_s25 = smov %s2863_s20 }
 0xa01   :  { %1869 = vsyncpa [#allocation7], 1 }
 0xa02   :  { %1871 = vsyncpa [#allocation7 + $0x1], 1 }

</bundles_post_ra>
